<compile_context>
chip_gen: v5e
topology: v5e:2x2
jax: 0.10.0
libtpu: 0.0.40
codegen_flags: <defaults>
</compile_context>

<pallas_src>
import functools

import numpy as np
import jax
import jax.numpy as jnp
from jax import lax
from jax.experimental import pallas as pl
from jax.experimental.pallas import tpu as pltpu

FR_XYZ = 15                      # number of frequencies in the embedder
PTS_FEAT_NUM = 32
HIDDEN = 32
PE_DIM = 3 + FR_XYZ * 2 * 3      # 93 (include_input + sin/cos per freq per dim)
SIN_ROWS = 48                    # 45 real freq rows + 3 zero rows (8-aligned sections)
SLAB_ROWS = 2 * SIN_ROWS + PTS_FEAT_NUM   # 128: [sin48 | cos48 | feats32]

# Exact powers of two (2^0 .. 2^14), shared by kernel and reference.
_FREQS = np.ldexp(np.float32(1.0), np.arange(FR_XYZ)).astype(np.float32)


# ----------------------------------------------------------------------------
# Reference-only positional encoding (torch column order:
# [x, sin(f0*x), cos(f0*x), sin(f1*x), cos(f1*x), ...], each applied per-dim).
# ----------------------------------------------------------------------------
def positional_encode(xyz):
    freqs = jnp.asarray(_FREQS)
    xf = xyz[..., None, :] * freqs[:, None]                    # (..., F, 3)
    s = jnp.sin(xf)
    c = jnp.cos(xf)
    sc = jnp.stack([s, c], axis=-2).reshape(*xyz.shape[:-1], FR_XYZ * 2 * 3)
    return jnp.concatenate([xyz, sc], axis=-1)                 # (..., 93)


# ----------------------------------------------------------------------------
# Pallas kernel: in-kernel PE -> fused fc1 (one MXU slab dot) -> fc2 + softmax
# All arrays are channel-major: channels on sublanes, points on lanes.
# ----------------------------------------------------------------------------
def decoder_kernel(xyz_ref, feats_ref, mw_ref, w1_ref, w2_ref, b2_ref,
                   out_ref, slab_ref):
    x = xyz_ref[...]                              # (3, tile)
    mw = mw_ref[...]                              # (80, 3) packed constants
    m = mw[0:SIN_ROWS, :]                         # (48, 3): 2^k at row 3k+d, col d
    wx = mw[SIN_ROWS:, :]                         # (32, 3): fused include-input weight

    # args[3k+d, n] = x_d[n] * 2^k, built with EXACT power-of-two mask-multiplies
    # (two of the three terms per row are exactly 0).  Rows 45:48 are all-zero.
    args = (x[0:1, :] * m[:, 0:1]
            + x[1:2, :] * m[:, 1:2]
            + x[2:3, :] * m[:, 2:3])              # (48, tile)

    # Lane-dense fc1 activation slab [sin | cos | pts_feats]; all section starts
    # (0, 48, 96) are multiples of 8 so the stores stay sublane-aligned.  The
    # zero-frequency pad rows hold sin(0)=0 / cos(0)=1; the first cos(0)=1 row
    # carries the fused fc1 bias via its column of w1.
    slab_ref[0:SIN_ROWS, :] = jnp.sin(args)
    slab_ref[SIN_ROWS:2 * SIN_ROWS, :] = jnp.cos(args)
    slab_ref[2 * SIN_ROWS:SLAB_ROWS, :] = feats_ref[...]

    # fc1 (xyz_linear folded in, bias folded onto the cos(0) column) as a single
    # K=128 MXU contraction, plus a tiny K=3 dot for the raw-xyz rows.
    h = (jnp.dot(w1_ref[...], slab_ref[...], preferred_element_type=jnp.float32)
         + jnp.dot(wx, x, preferred_element_type=jnp.float32))
    h = jnp.maximum(h, 0.0)                       # (32, tile)

    # fc2 + 2-way softmax, fully lane-dense; denominator via approx EUP vrcp;
    # single (2, tile) store.
    logits = jnp.dot(w2_ref[...], h, preferred_element_type=jnp.float32) + b2_ref[...]
    mx = jnp.maximum(logits[0:1, :], logits[1:2, :])
    e = jnp.exp(logits - mx)                      # (2, tile)
    r = pl.reciprocal(e[0:1, :] + e[1:2, :], approx=True)
    out_ref[...] = e * r


# ----------------------------------------------------------------------------
# Wrapper: parameter fusion / packing + pallas_call
# ----------------------------------------------------------------------------
def _fuse_params(params):
    wx, bx, w1, b1, w2, b2 = (params["wx"], params["bx"], params["w1"],
                              params["b1"], params["w2"], params["b2"])
    w1a = w1[:PTS_FEAT_NUM]                    # (32,32) xyz-branch rows of fc1
    w1b = w1[PTS_FEAT_NUM:]                    # (32,32) pts_feats rows of fc1

    hp = lax.Precision.HIGHEST
    # Fold xyz_linear into fc1 (valid: no nonlinearity between them).
    w_f = jnp.dot(wx, w1a, precision=hp)                 # (93, 32)
    b_f = (jnp.dot(bx, w1a, precision=hp) + b1)[0]       # (32,)

    w_xyz = w_f[:3]                                       # (3, 32) include-input rows
    w_sc = w_f[3:].reshape(FR_XYZ, 2, 3, HIDDEN)          # [freq, sin|cos, dim, out]
    w_sin = w_sc[:, 0].reshape(3 * FR_XYZ, HIDDEN)        # row order 3k+d
    w_cos = w_sc[:, 1].reshape(3 * FR_XYZ, HIDDEN)

    # Fused fc1 weight over slab rows [sin48 | cos48 | feats32]; zero columns on
    # the pad rows except column 93 (cos(0)=1), which carries the fused bias.
    w1f = jnp.zeros((HIDDEN, SLAB_ROWS), jnp.float32)
    w1f = w1f.at[:, 0:3 * FR_XYZ].set(w_sin.T)
    w1f = w1f.at[:, SIN_ROWS:SIN_ROWS + 3 * FR_XYZ].set(w_cos.T)
    w1f = w1f.at[:, SIN_ROWS + 3 * FR_XYZ].set(b_f)       # cos(0)=1 row -> bias
    w1f = w1f.at[:, 2 * SIN_ROWS:].set(w1b.T)

    # Packed (80,3): rows 0:48 = frequency masks (2^k at row 3k+d, col d; rows
    # 45:48 zero), rows 48:80 = fused include-input weight (32,3).
    masks = np.zeros((SIN_ROWS, 3), np.float32)
    for k in range(FR_XYZ):
        for d in range(3):
            masks[3 * k + d, d] = _FREQS[k]
    mw = jnp.concatenate([jnp.asarray(masks), w_xyz.T], axis=0)

    return mw, w1f, w2.T, b2.T                  # (80,3), (32,128), (2,32), (2,1)


def weight_decoder_forward(xyz, pts_feats, params, *, tile_m=8192):
    """xyz: (B, P, 3), pts_feats: (B, P, 32) -> (B, P, 2)."""
    B, P, _ = xyz.shape
    N = B * P
    assert tile_m >= 128

    # Channel-major inputs: point axis on the 128-lane dimension.
    xyz_t = xyz.reshape(N, 3).astype(jnp.float32).T                    # (3, N)
    feats_t = pts_feats.reshape(N, PTS_FEAT_NUM).astype(jnp.float32).T  # (32, N)

    mw, w1f, w2t, b2t = _fuse_params(params)

    n_lanes = ((N + 127) // 128) * 128
    tile = ((min(int(tile_m), n_lanes) + 127) // 128) * 128
    # Keep >= 2 grid steps when there is enough work, so v7x's two TensorCores
    # both get a share of the "parallel" axis (v5e/v6e are single-TC, unaffected).
    if tile >= n_lanes and n_lanes >= 256:
        tile = ((n_lanes // 2 + 127) // 128) * 128
    grid = (pl.cdiv(N, tile),)   # ragged tail handled by Pallas boundary blocks

    out = pl.pallas_call(
        decoder_kernel,
        out_shape=jax.ShapeDtypeStruct((2, N), jnp.float32),
        grid_spec=pltpu.PrefetchScalarGridSpec(
            num_scalar_prefetch=0,
            grid=grid,
            in_specs=[
                pl.BlockSpec((3, tile), lambda i: (0, i)),             # xyz
                pl.BlockSpec((PTS_FEAT_NUM, tile), lambda i: (0, i)),  # pts_feats
                pl.BlockSpec(mw.shape, lambda i: (0, 0)),              # masks | wx
                pl.BlockSpec(w1f.shape, lambda i: (0, 0)),             # fused fc1
                pl.BlockSpec(w2t.shape, lambda i: (0, 0)),             # fc2 weight
                pl.BlockSpec(b2t.shape, lambda i: (0, 0)),             # fc2 bias
            ],
            out_specs=pl.BlockSpec((2, tile), lambda i: (0, i)),
            scratch_shapes=[pltpu.VMEM((SLAB_ROWS, tile), jnp.float32)],
        ),
        compiler_params=pltpu.CompilerParams(
            dimension_semantics=("parallel",),
            # ~15 MiB worst-case footprint at tile=8192; 32 MiB matches the
            # v6e/v7x scoped default and raises v5e's 16 MiB default.  Do NOT
            # claim 64 MiB (entire physical VMEM on v7x).
            vmem_limit_bytes=32 * 1024 * 1024),
    )(xyz_t, feats_t, mw, w1f, w2t, b2t)

    return out.T.reshape(B, P, 2)


# ----------------------------------------------------------------------------
# Synthetic parameters + pure-JAX reference (mirrors the PyTorch forward).
# ----------------------------------------------------------------------------
def init_params(key):
    k = jax.random.split(key, 6)
    scale = 0.1
    return {
        "wx": scale * jax.random.normal(k[0], (PE_DIM, PTS_FEAT_NUM), jnp.float32),
        "bx": scale * jax.random.normal(k[1], (1, PTS_FEAT_NUM), jnp.float32),
        "w1": scale * jax.random.normal(k[2], (2 * PTS_FEAT_NUM, HIDDEN), jnp.float32),
        "b1": scale * jax.random.normal(k[3], (1, HIDDEN), jnp.float32),
        "w2": scale * jax.random.normal(k[4], (HIDDEN, 2), jnp.float32),
        "b2": scale * jax.random.normal(k[5], (1, 2), jnp.float32),
    }


def reference_forward(xyz, pts_feats, params):
    pe = positional_encode(xyz)
    a = pe @ params["wx"] + params["bx"][0]
    h = jnp.concatenate([a, pts_feats], axis=-1)
    h = jax.nn.relu(h @ params["w1"] + params["b1"][0])
    return jax.nn.softmax(h @ params["w2"] + params["b2"][0], axis=-1)


if __name__ == "__main__":
    key = jax.random.PRNGKey(0)
    kp, kx, kf = jax.random.split(key, 3)

    B, P = 2, 64
    xyz = jax.random.uniform(kx, (B, P, 3), jnp.float32, minval=-1.0, maxval=1.0)
    pts_feats = jax.random.normal(kf, (B, P, PTS_FEAT_NUM), jnp.float32)
    params = init_params(kp)

    fwd = jax.jit(functools.partial(weight_decoder_forward, params=params))
    out = jax.block_until_ready(fwd(xyz, pts_feats))

    ref = reference_forward(xyz, pts_feats, params)
    assert out.shape == (B, P, 2)
    # sin/cos args reach 2^14*|x|; ulp-level argument-reduction differences
    # between the in-kernel and XLA transcendental paths, the algebraic fc
    # fusion, and the approx EUP reciprocal stay well below 2e-3 on the output
    # probabilities, which still catches any structural/layout error.
    assert jnp.allclose(out, ref, atol=2e-3, rtol=1e-5), "mismatch vs reference"

    print("KERNEL_OK")
</pallas_src>

<mosaic_0001>
module attributes {stable_mosaic.version = 11 : i64} {
  func.func @decoder_kernel(%arg0: i32, %arg1: memref<3x128xf32, #tpu.memory_space<vmem>>, %arg2: memref<32x128xf32, #tpu.memory_space<vmem>>, %arg3: memref<80x3xf32, #tpu.memory_space<vmem>>, %arg4: memref<32x128xf32, #tpu.memory_space<vmem>>, %arg5: memref<2x32xf32, #tpu.memory_space<vmem>>, %arg6: memref<2x1xf32, #tpu.memory_space<vmem>>, %arg7: memref<2x128xf32, #tpu.memory_space<vmem>>, %arg8: memref<128x128xf32, #tpu.memory_space<vmem>>) attributes {dimension_semantics = [#tpu.dimension_semantics<parallel>], iteration_bounds = array<i64: 1>, scalar_prefetch = 0 : i64, scratch_operands = 1 : i64, tpu.core_type = #tpu.core_type<tc>, window_params = [{transform_indices = @transform_0, window_bounds = array<i64: 3, 128>}, {transform_indices = @transform_1, window_bounds = array<i64: 32, 128>}, {pipeline_mode = #tpu.pipeline_mode<synchronous>, transform_indices = @transform_2, window_bounds = array<i64: 80, 3>}, {pipeline_mode = #tpu.pipeline_mode<synchronous>, transform_indices = @transform_3, window_bounds = array<i64: 32, 128>}, {pipeline_mode = #tpu.pipeline_mode<synchronous>, transform_indices = @transform_4, window_bounds = array<i64: 2, 32>}, {pipeline_mode = #tpu.pipeline_mode<synchronous>, transform_indices = @transform_5, window_bounds = array<i64: 2, 1>}, {transform_indices = @transform_6, window_bounds = array<i64: 2, 128>}]} {
    %c0 = arith.constant 0 : index
    %c0_0 = arith.constant 0 : index
    %0 = vector.load %arg1[%c0, %c0_0] : memref<3x128xf32, #tpu.memory_space<vmem>>, vector<3x128xf32>
    %c0_1 = arith.constant 0 : index
    %c0_2 = arith.constant 0 : index
    %1 = vector.load %arg3[%c0_1, %c0_2] : memref<80x3xf32, #tpu.memory_space<vmem>>, vector<80x3xf32>
    %2 = vector.extract_strided_slice %1 {offsets = [0, 0], sizes = [48, 3], strides = [1, 1]} : vector<80x3xf32> to vector<48x3xf32>
    %3 = vector.extract_strided_slice %1 {offsets = [48, 0], sizes = [32, 3], strides = [1, 1]} : vector<80x3xf32> to vector<32x3xf32>
    %4 = vector.extract_strided_slice %0 {offsets = [0, 0], sizes = [1, 128], strides = [1, 1]} : vector<3x128xf32> to vector<1x128xf32>
    %5 = vector.extract_strided_slice %2 {offsets = [0, 0], sizes = [48, 1], strides = [1, 1]} : vector<48x3xf32> to vector<48x1xf32>
    %6 = vector.broadcast %4 : vector<1x128xf32> to vector<48x128xf32>
    %7 = vector.broadcast %5 : vector<48x1xf32> to vector<48x128xf32>
    %8 = arith.mulf %6, %7 : vector<48x128xf32>
    %9 = vector.extract_strided_slice %0 {offsets = [1, 0], sizes = [1, 128], strides = [1, 1]} : vector<3x128xf32> to vector<1x128xf32>
    %10 = vector.extract_strided_slice %2 {offsets = [0, 1], sizes = [48, 1], strides = [1, 1]} : vector<48x3xf32> to vector<48x1xf32>
    %11 = vector.broadcast %9 : vector<1x128xf32> to vector<48x128xf32>
    %12 = vector.broadcast %10 : vector<48x1xf32> to vector<48x128xf32>
    %13 = arith.mulf %11, %12 : vector<48x128xf32>
    %14 = arith.addf %8, %13 : vector<48x128xf32>
    %15 = vector.extract_strided_slice %0 {offsets = [2, 0], sizes = [1, 128], strides = [1, 1]} : vector<3x128xf32> to vector<1x128xf32>
    %16 = vector.extract_strided_slice %2 {offsets = [0, 2], sizes = [48, 1], strides = [1, 1]} : vector<48x3xf32> to vector<48x1xf32>
    %17 = vector.broadcast %15 : vector<1x128xf32> to vector<48x128xf32>
    %18 = vector.broadcast %16 : vector<48x1xf32> to vector<48x128xf32>
    %19 = arith.mulf %17, %18 : vector<48x128xf32>
    %20 = arith.addf %14, %19 : vector<48x128xf32>
    %21 = math.sin %20 : vector<48x128xf32>
    %c0_3 = arith.constant 0 : index
    %c0_4 = arith.constant 0 : index
    %22 = vector.load %arg8[%c0_3, %c0_4] : memref<128x128xf32, #tpu.memory_space<vmem>>, vector<48x128xf32>
    tpu.vector_store %arg8[%c0_3, %c0_4], %21 {strides = array<i32>} : memref<128x128xf32, #tpu.memory_space<vmem>>, vector<48x128xf32>,
    %23 = math.cos %20 : vector<48x128xf32>
    %c48 = arith.constant 48 : index
    %c0_5 = arith.constant 0 : index
    %24 = vector.load %arg8[%c48, %c0_5] : memref<128x128xf32, #tpu.memory_space<vmem>>, vector<48x128xf32>
    tpu.vector_store %arg8[%c48, %c0_5], %23 {strides = array<i32>} : memref<128x128xf32, #tpu.memory_space<vmem>>, vector<48x128xf32>,
    %c0_6 = arith.constant 0 : index
    %c0_7 = arith.constant 0 : index
    %25 = vector.load %arg2[%c0_6, %c0_7] : memref<32x128xf32, #tpu.memory_space<vmem>>, vector<32x128xf32>
    %c96 = arith.constant 96 : index
    %c0_8 = arith.constant 0 : index
    %26 = vector.load %arg8[%c96, %c0_8] : memref<128x128xf32, #tpu.memory_space<vmem>>, vector<32x128xf32>
    tpu.vector_store %arg8[%c96, %c0_8], %25 {strides = array<i32>} : memref<128x128xf32, #tpu.memory_space<vmem>>, vector<32x128xf32>,
    %c0_9 = arith.constant 0 : index
    %c0_10 = arith.constant 0 : index
    %27 = vector.load %arg4[%c0_9, %c0_10] : memref<32x128xf32, #tpu.memory_space<vmem>>, vector<32x128xf32>
    %c0_11 = arith.constant 0 : index
    %c0_12 = arith.constant 0 : index
    %28 = vector.load %arg8[%c0_11, %c0_12] : memref<128x128xf32, #tpu.memory_space<vmem>>, vector<128x128xf32>
    %cst = arith.constant dense<0.000000e+00> : vector<32x128xf32>
    %29 = tpu.matmul %27, %28, %cst {dimension_numbers = #tpu.dot_dimension_numbers<[1], [0], [0], [1], [0, 0, 1, 1], [], []>} : vector<32x128xf32>, vector<128x128xf32>, vector<32x128xf32> -> vector<32x128xf32>
    %cst_13 = arith.constant dense<0.000000e+00> : vector<32x128xf32>
    %30 = tpu.matmul %3, %0, %cst_13 {dimension_numbers = #tpu.dot_dimension_numbers<[1], [0], [0], [1], [0, 0, 1, 1], [], []>} : vector<32x3xf32>, vector<3x128xf32>, vector<32x128xf32> -> vector<32x128xf32>
    %31 = arith.addf %29, %30 : vector<32x128xf32>
    %cst_14 = arith.constant 0.000000e+00 : f32
    %32 = vector.broadcast %cst_14 : f32 to vector<32x128xf32>
    %33 = arith.maximumf %31, %32 : vector<32x128xf32>
    %c0_15 = arith.constant 0 : index
    %c0_16 = arith.constant 0 : index
    %34 = vector.load %arg5[%c0_15, %c0_16] : memref<2x32xf32, #tpu.memory_space<vmem>>, vector<2x32xf32>
    %cst_17 = arith.constant dense<0.000000e+00> : vector<2x128xf32>
    %35 = tpu.matmul %34, %33, %cst_17 {dimension_numbers = #tpu.dot_dimension_numbers<[1], [0], [0], [1], [0, 0, 1, 1], [], []>} : vector<2x32xf32>, vector<32x128xf32>, vector<2x128xf32> -> vector<2x128xf32>
    %c0_18 = arith.constant 0 : index
    %c0_19 = arith.constant 0 : index
    %36 = vector.load %arg6[%c0_18, %c0_19] : memref<2x1xf32, #tpu.memory_space<vmem>>, vector<2x1xf32>
    %37 = vector.broadcast %36 : vector<2x1xf32> to vector<2x128xf32>
    %38 = arith.addf %35, %37 : vector<2x128xf32>
    %39 = vector.extract_strided_slice %38 {offsets = [0, 0], sizes = [1, 128], strides = [1, 1]} : vector<2x128xf32> to vector<1x128xf32>
    %40 = vector.extract_strided_slice %38 {offsets = [1, 0], sizes = [1, 128], strides = [1, 1]} : vector<2x128xf32> to vector<1x128xf32>
    %41 = arith.maximumf %39, %40 : vector<1x128xf32>
    %42 = vector.broadcast %41 : vector<1x128xf32> to vector<2x128xf32>
    %43 = arith.subf %38, %42 : vector<2x128xf32>
    %44 = math.exp %43 : vector<2x128xf32>
    %45 = vector.extract_strided_slice %44 {offsets = [0, 0], sizes = [1, 128], strides = [1, 1]} : vector<2x128xf32> to vector<1x128xf32>
    %46 = vector.extract_strided_slice %44 {offsets = [1, 0], sizes = [1, 128], strides = [1, 1]} : vector<2x128xf32> to vector<1x128xf32>
    %47 = arith.addf %45, %46 : vector<1x128xf32>
    %48 = tpu.reciprocal %47 {approx = true} : vector<1x128xf32> -> vector<1x128xf32>
    %49 = vector.broadcast %48 : vector<1x128xf32> to vector<2x128xf32>
    %50 = arith.mulf %44, %49 : vector<2x128xf32>
    %c0_20 = arith.constant 0 : index
    %c0_21 = arith.constant 0 : index
    %51 = vector.load %arg7[%c0_20, %c0_21] : memref<2x128xf32, #tpu.memory_space<vmem>>, vector<2x128xf32>
    tpu.vector_store %arg7[%c0_20, %c0_21], %50 {strides = array<i32>} : memref<2x128xf32, #tpu.memory_space<vmem>>, vector<2x128xf32>,
    return
  }
  func.func @transform_0(%arg0: i32) -> (i32, i32) {
    %c0_i32 = arith.constant 0 : i32
    %c0_i32_0 = arith.constant 0 : i32
    return %c0_i32, %arg0 : i32, i32
  }
  func.func @transform_1(%arg0: i32) -> (i32, i32) {
    %c0_i32 = arith.constant 0 : i32
    %c0_i32_0 = arith.constant 0 : i32
    return %c0_i32, %arg0 : i32, i32
  }
  func.func @transform_2(%arg0: i32) -> (i32, i32) {
    %c0_i32 = arith.constant 0 : i32
    %c0_i32_0 = arith.constant 0 : i32
    %c0_i32_1 = arith.constant 0 : i32
    return %c0_i32, %c0_i32_0 : i32, i32
  }
  func.func @transform_3(%arg0: i32) -> (i32, i32) {
    %c0_i32 = arith.constant 0 : i32
    %c0_i32_0 = arith.constant 0 : i32
    %c0_i32_1 = arith.constant 0 : i32
    return %c0_i32, %c0_i32_0 : i32, i32
  }
  func.func @transform_4(%arg0: i32) -> (i32, i32) {
    %c0_i32 = arith.constant 0 : i32
    %c0_i32_0 = arith.constant 0 : i32
    %c0_i32_1 = arith.constant 0 : i32
    return %c0_i32, %c0_i32_0 : i32, i32
  }
  func.func @transform_5(%arg0: i32) -> (i32, i32) {
    %c0_i32 = arith.constant 0 : i32
    %c0_i32_0 = arith.constant 0 : i32
    %c0_i32_1 = arith.constant 0 : i32
    return %c0_i32, %c0_i32_0 : i32, i32
  }
  func.func @transform_6(%arg0: i32) -> (i32, i32) {
    %c0_i32 = arith.constant 0 : i32
    %c0_i32_0 = arith.constant 0 : i32
    return %c0_i32, %arg0 : i32, i32
  }
}

</mosaic_0001>

<bundles_post_ra>
// kernel: weight_decoder_forward.1
= control target key start
LH: loop header
LB: loop body
LE: loop exit
PB: predicated region body
PF: predicated region fallthrough
CT: control target
= control target key end

     0   :  { %v2269_v0 = vmov 1   ;;  %v3411_v1 = vmov 0   ;;  %v2271_v4 = vmov 2   ;;  %vm2052_vm3 = vcmask 1042432   ;;  %s3392_s2 = inlined_call_operand.vmem [shape: f32[80,3], index: 2, kind: input, shape index: {}]   ;;  %s3393_s0 = inlined_call_operand.vmem [shape: f32[3,128], index: 0, kind: input, shape index: {}]   ;;  %s3394_s1 = inlined_call_operand.vmem [shape: f32[32,128], index: 1, kind: input, shape index: {}]   ;;  %s3395_s3 = inlined_call_operand.vmem [shape: f32[32,128], index: 3, kind: input, shape index: {}]   ;;  %s3396_s5 = inlined_call_operand.vmem [shape: f32[2,1], index: 5, kind: input, shape index: {}]   ;;  %s3397_s4 = inlined_call_operand.vmem [shape: f32[2,32], index: 4, kind: input, shape index: {}]   ;;  %s3398_s6 = inlined_call_operand.vmem [shape: f32[2,128], index: 6, kind: output, shape index: {}]  }
   0x1   :  { %2252 = vset.pattern.permute.xlu0 %v2269_v0  ;;  %2254 = vset.pattern.permute.xlu1 %v3411_v1  ;;  %v29_v2 = vld [vmem:[%s3392_s2 + $0x28] sm:$0xff]  ;;  %v28_v3 = vld [vmem:[%s3392_s2 + $0x20] sm:$0xff]  ;;  %v27_v5 = vld [vmem:[%s3392_s2 + $0x18] sm:$0xff] }
   0x2   :  { %93 = vperm.xlu0 %2252, %v29_v2   ;;  %57 = vperm.xlu1 %2254, %v28_v3   ;;  %v26_v6 = vld [vmem:[%s3392_s2 + $0x10] sm:$0xff]  ;;  %v25_v7 = vld [vmem:[%s3392_s2 + $0x8] sm:$0xff]  ;;  %v24_v8 = vld [vmem:[%s3392_s2] sm:$0xff] }
   0x3   :  { %2256 = vset.pattern.permute.xlu2 %v2271_v4  ;;  %v2339_v14 = vld [vmem:[%s3393_s0] sm:$0x7] }
   0x4   :  { %130 = vperm.xlu2 %2256, %v29_v2   ;;  %v71_v15 = vperm.slane %v2339_v14, 1  ;;  %v2343_v16 = vperm.slane %v2339_v14, 0  ;;  %v2346_v17 = vperm.slane %v2339_v14, 2  ;;  %2205 = vmatpush.msk.msra.mxu0 %vm2052_vm3, %v2339_v14 }
   0xa   :  { %2253 = vset.pattern.permute.xlu0 %v3411_v1  ;;  %2255 = vset.pattern.permute.xlu1 %v2269_v0 }
   0xb   :  { %62 = vperm.xlu0 %2253, %v29_v2   ;;  %89 = vperm.xlu1 %2255, %v28_v3  }
   0xc   :  { %2257 = vset.pattern.permute.xlu2 %v3411_v1 }
   0xd   :  { %52 = vperm.xlu2 %2257, %v27_v5  }
  0x13   :  { %85 = vperm.xlu1 %2255, %v27_v5   ;;  %47 = vperm.xlu0 %2253, %v26_v6  }
  0x15   :  { %2258 = vset.pattern.permute.xlu2 %v2271_v4 }
  0x16   :  { %126 = vperm.xlu2 %2258, %v28_v3  }
  0x1b   :  { %81 = vperm.xlu1 %2255, %v26_v6   ;;  %2261 = vset.pattern.permute.xlu0 %v2271_v4 }
  0x1c   :  { %118 = vperm.xlu0 %2261, %v26_v6  }
  0x1e   :  { %122 = vperm.xlu2 %2258, %v27_v5  }
  0x23   :  { %2259 = vset.pattern.permute.xlu1 %v3411_v1 }
  0x24   :  { %42 = vperm.xlu1 %2259, %v25_v7   ;;  %2264 = vset.pattern.permute.xlu0 %v3411_v1 }
  0x26   :  { %2260 = vset.pattern.permute.xlu2 %v2269_v0 }
  0x27   :  { %77 = vperm.xlu2 %2260, %v25_v7  }
  0x2c   :  { %37 = vperm.xlu1 %2259, %v24_v8  }
  0x2f   :  { %73 = vperm.xlu2 %2260, %v24_v8  }
  0x34   :  { %2262 = vset.pattern.permute.xlu1 %v2271_v4 }
  0x35   :  { %114 = vperm.xlu1 %2262, %v25_v7  }
  0x37   :  { %2263 = vset.pattern.permute.xlu2 %v2271_v4 }
  0x38   :  { %110 = vperm.xlu2 %2263, %v24_v8  }
  0x5e   :  { %v131_v9 = vpop.permute.xlu2 %130 }
  0x5f   :  { %v138_v26 = vmul.f32 %v131_v9, %v2346_v17 }
  0x67   :  { %v53_v10 = vpop.permute.xlu2 %52 }
  0x68   :  { %v68_v38 = vmul.f32 %v53_v10, %v2343_v16 }
  0x70   :  { %v127_v11 = vpop.permute.xlu2 %126 }
  0x71   :  { %v137_v25 = vmul.f32 %v127_v11, %v2346_v17 }
  0x74   :  { %v58_v12 = vpop.permute.xlu1 %57  ;;  %v94_v13 = vpop.permute.xlu0 %93 }
  0x75   :  { %v101_v18 = vmul.f32 %v94_v13, %v71_v15  ;;  %v69_v22 = vmul.f32 %v58_v12, %v2343_v16 }
  0x78   :  { %v123_v19 = vpop.permute.xlu2 %122 }
  0x79   :  { %v136_v43 = vmul.f32 %v123_v19, %v2346_v17  ;;  %v3409_v19 = vmov 2475754826  }
  0x7d   :  { %v63_v20 = vpop.permute.xlu0 %62  ;;  %v90_v21 = vpop.permute.xlu1 %89 }
  0x7e   :  { %v70_v23 = vmul.f32 %v63_v20, %v2343_v16  ;;  %v100_v24 = vmul.f32 %v90_v21, %v71_v15  ;;  %v3404_v21 = vmov 2131351028  }
  0x80   :  { %v107_v27 = vadd.f32 %v101_v18, %v70_v23  ;;  %v106_v28 = vadd.f32 %v100_v24, %v69_v22  ;;  %v3400_v22 = vmov 920167782  }
  0x81   :  { %v78_v39 = vpop.permute.xlu2 %77 }
  0x82   :  { %v2352_v29 = vadd.f32 %v138_v26, %v107_v27  ;;  %v2354_v30 = vadd.f32 %v137_v25, %v106_v28  ;;  %v97_v5 = vmul.f32 %v78_v39, %v71_v15  ;;  %v3406_v25 = vmov 683565275  }
  0x83   :  { %v3402_v28 = vmov 2102212464  }
  0x84   :  { %v923_v31 = vand.u32 2139095040, %v2352_v29  ;;  %v768_v32 = vand.u32 2139095040, %v2354_v30  ;;  %v920_v46 = vand.u32 2147483647, %v2352_v29  ;;  %v3399_v53 = vand.u32 2147483647, %v2354_v30 }
  0x85   :  { %v86_v33 = vpop.permute.xlu1 %85  ;;  %v48_v34 = vpop.permute.xlu0 %47 }
  0x86   :  { %v924_v35 = vshrl.u32 %v923_v31, 23  ;;  %v769_v36 = vshrl.u32 %v768_v32, 23  ;;  %v99_v37 = vmul.f32 %v86_v33, %v71_v15  ;;  %v67_v49 = vmul.f32 %v48_v34, %v2343_v16 }
  0x87   :  { %v927_v52 = vand.u32 8388607, %v920_v46  ;;  %v2371_v62 = vand.u32 8388607, %v3399_v53 }
  0x88   :  { %v2184_v40 = vadd.s32 4294967169, %v924_v35  ;;  %v2181_v41 = vadd.s32 4294967169, %v769_v36  ;;  %v105_v42 = vadd.f32 %v99_v37, %v68_v38  ;;  %v2277_v35 = vmov 1326507024  }
  0x89   :  { %v74_v60 = vpop.permute.xlu2 %73  ;;  %v928_v61 = vor.u32 8388608, %v927_v52  ;;  %v773_v9 = vor.u32 8388608, %v2371_v62 }
  0x8a   :  { %v930_v44 = vadd.s32 1, %v2184_v40  ;;  %v775_v45 = vadd.s32 1, %v2181_v41  ;;  %v2361_v48 = vadd.f32 %v136_v43, %v105_v42  ;;  %v96_v7 = vmul.f32 %v74_v60, %v71_v15 }
  0x8b   :  { %v2380_v8 = vshll.u32 %v928_v61, 8  ;;  %v2012_v61 = vld [vmem:[%s3394_s1 + $0x8] sm:$0xff] }
  0x8c   :  { %vm931_vm0 = vcmp.gt.s32.totalorder %v930_v44, 0  ;;  %vm776_vm1 = vcmp.gt.s32.totalorder %v775_v45, 0  ;;  %v613_v58 = vand.u32 2139095040, %v2361_v48 }
  0x8d   :  { %v932_v47 = vsel %vm931_vm0, %v930_v44, 0  ;;  %v82_v50 = vpop.permute.xlu1 %81  ;;  %v777_v57 = vsel %vm776_vm1, %v775_v45, 0 }
  0x8e   :  { %v119_v51 = vpop.permute.xlu0 %118  ;;  %v98_v54 = vmul.f32 %v82_v50, %v71_v15  ;;  %v934_v56 = vand.u32 31, %v932_v47  ;;  %v2377_v2 = vand.u32 31, %v777_v57  ;;  %v614_v3 = vshrl.u32 %v613_v58, 23 }
  0x8f   :  { %v135_v55 = vmul.f32 %v119_v51, %v2346_v17  ;;  %v2383_v10 = vshrl.u32 %v932_v47, 5  ;;  %v2385_v11 = vshrl.u32 %v777_v57, 5  ;;  %v2013_v57 = vld [vmem:[%s3394_s1 + $0x10] sm:$0xff] }
  0x90   :  { %v104_v59 = vadd.f32 %v98_v54, %v67_v49  ;;  %v2375_v0 = vsub.s32 32, %v934_v56  ;;  %v2389_v18 = vsub.s32 32, %v2377_v2  ;;  %v2178_v24 = vadd.s32 4294967169, %v614_v3 }
  0x91   :  { %v937_v26 = vshll.u32 %v3406_v25, %v934_v56  ;;  %v940_v27 = vshll.u32 %v3409_v19, %v934_v56  ;;  %v946_v34 = vshll.u32 %v3402_v28, %v934_v56  ;;  %v791_v37 = vshll.u32 %v3402_v28, %v2377_v2 }
  0x92   :  { %v2373_v63 = vadd.f32 %v135_v55, %v104_v59  ;;  %v938_v20 = vshrl.u32 %v3409_v19, %v2375_v0  ;;  %v941_v15 = vshrl.u32 %v3404_v21, %v2375_v0  ;;  %v947_v23 = vshrl.u32 %v3400_v22, %v2375_v0  ;;  %v111_v39 = vpop.permute.xlu2 %110 }
  0x93   :  { %v944_v31 = vshrl.u32 %v3402_v28, %v2375_v0  ;;  %v950_v36 = vshrl.u32 %v2277_v35, %v2375_v0  ;;  %v2410_v38 = vshll.u32 %v3400_v22, %v2377_v2  ;;  %v943_v40 = vshll.u32 %v3404_v21, %v934_v56 }
  0x94   :  { %v458_v4 = vand.u32 2139095040, %v2373_v63  ;;  %v949_v41 = vshll.u32 %v3400_v22, %v934_v56  ;;  %v2414_v43 = vor.u32 %v938_v20, %v937_v26  ;;  %v2416_v44 = vor.u32 %v941_v15, %v940_v27  ;;  %v2014_v56 = vld [vmem:[%s3394_s1 + $0x18] sm:$0xff]  ;;  %v2011_v20 = vld [vmem:[%s3394_s1] sm:$0xff] }
  0x95   :  { %v948_v45 = vor.u32 %v947_v23, %v946_v34  ;;  %v792_v47 = vshrl.u32 %v3400_v22, %v2389_v18  ;;  %v2422_v49 = vshrl.u32 %v2277_v35, %v2389_v18  ;;  %v2424_v50 = vor.u32 %v944_v31, %v943_v40  ;;  %2211 = vmatpush.msra.mxu1 %v2014_v56 }
  0x96   :  { %v43_v6 = vpop.permute.xlu1 %42  ;;  %v459_v12 = vshrl.u32 %v458_v4, 23  ;;  %v951_v51 = vor.u32 %v950_v36, %v949_v41  ;;  %v620_v52 = vadd.s32 1, %v2178_v24  ;;  %v133_v55 = vmul.f32 %v111_v39, %v2346_v17  ;;  %2085 = vmatpush.msrb.mxu0 %v2014_v56  ;;  %2212 = vmatpush.msra.mxu3 %v2014_v56 }
  0x97   :  { %v66_v13 = vmul.f32 %v43_v6, %v2343_v16  ;;  %vm952_vm4 = vcmp.lt.s32.totalorder %v2383_v10, 1  ;;  %vm955_vm5 = vcmp.lt.s32.totalorder %v2383_v10, 4  ;;  %vm954_vm6 = vcmp.lt.s32.totalorder %v2383_v10, 3  ;;  %2213 = vmatpush.msra.mxu1 %v2013_v57 }
  0x98   :  { %v2175_v32 = vadd.s32 4294967169, %v459_v12  ;;  %v960_v14 = vsel %vm952_vm4, %v2414_v43, %v2416_v44  ;;  %v965_v6 = vsel %vm955_vm5, %v951_v51, 1326507024  ;;  %v2461_v12 = vor.u32 %v792_v47, %v791_v37  ;;  %2086 = vmatpush.msrb.mxu0 %v2013_v57  ;;  %2214 = vmatpush.msra.mxu3 %v2013_v57 }
  0x99   :  { %v2401_v33 = vadd.f32 %v97_v5, %v66_v13  ;;  %v964_v5 = vsel %vm952_vm4, %v2416_v44, %v2424_v50  ;;  %v796_v13 = vor.u32 %v2422_v49, %v2410_v38  ;;  %vm953_vm7 = vcmp.lt.s32.totalorder %v2383_v10, 2  ;;  %2215 = vmatpush.msra.mxu1 %v2012_v61 }
  0x9a   :  { %v465_v42 = vadd.s32 1, %v2175_v32  ;;  %vm621_vm8 = vcmp.gt.s32.totalorder %v620_v52, 0  ;;  %v966_v24 = vsel %vm954_vm6, %v948_v45, %v965_v6  ;;  %2087 = vmatpush.msrb.mxu0 %v2012_v61  ;;  %2216 = vmatpush.msra.mxu3 %v2012_v61  ;;  %v969_v32 = vand.u32 65535, %v2380_v8 }
  0x9b   :  { %v967_v31 = vsel %vm953_vm7, %v964_v5, %v966_v24  ;;  %2217 = vmatpush.msra.mxu1 %v2011_v20  ;;  %v970_v36 = vshrl.u32 %v2380_v8, 16  ;;  %vm800_vm9 = vcmp.lt.s32.totalorder %v2385_v11, 4  ;;  %v622_v39 = vsel %vm621_vm8, %v620_v52, 0 }
  0x9c   :  { %vm466_vm2 = vcmp.gt.s32.totalorder %v465_v42, 0  ;;  %v971_v37 = vand.u32 65535, %v967_v31  ;;  %v972_v38 = vshrl.u32 %v967_v31, 16  ;;  %2088 = vmatpush.msrb.mxu0 %v2011_v20  ;;  %2218 = vmatpush.msra.mxu3 %v2011_v20  ;;  %v936_v47 = vshrl.u32 %v3406_v25, %v2375_v0 }
  0x9d   :  { %v2433_v58 = vsel %vm466_vm2, %v465_v42, 0  ;;  %v2504_v52 = vsel %vm800_vm9, %v796_v13, 1326507024  ;;  %v2507_v57 = vshrl.u32 %v622_v39, 5  ;;  %v2509_v0 = vand.u32 31, %v622_v39 }
  0x9e   :  { %v38_v54 = vpop.permute.xlu1 %37  ;;  %v2440_v60 = vand.u32 31, %v2433_v58  ;;  %v974_v49 = vmul.u32 %v972_v38, %v969_v32  ;;  %v975_v51 = vmul.u32 %v971_v37, %v970_v36  ;;  %v973_v61 = vmul.u32 %v971_v37, %v969_v32 }
  0x9f   :  { %v65_v59 = vmul.f32 %v38_v54, %v2343_v16  ;;  %v961_v16 = vsel %vm955_vm5, %v948_v45, 920167782  ;;  %v2500_v54 = vsel %vm800_vm9, %v2461_v12, 920167782  ;;  %vm645_vm1 = vcmp.lt.s32.totalorder %v2507_v57, 4 }
  0xa0   :  { %v962_v4 = vsel %vm954_vm6, %v2424_v50, %v961_v16  ;;  %v2480_v26 = vshll.u32 %v3400_v22, %v2440_v60  ;;  %v979_v6 = vshll.u32 %v975_v51, 16  ;;  %v978_v39 = vshrl.u32 %v974_v49, 16 }
  0xa1   :  { %v102_v3 = vadd.f32 %v96_v7, %v65_v59  ;;  %v2466_v7 = vsub.s32 32, %v2440_v60  ;;  %v963_v23 = vsel %vm953_vm7, %v960_v14, %v962_v4  ;;  %v977_v14 = vshll.u32 %v974_v49, 16 }
  0xa2   :  { %v994_v41 = vshrl.u32 %v963_v23, 16  ;;  %v993_v56 = vand.u32 65535, %v963_v23  ;;  %v957_v49 = vsel %vm955_vm5, %v2424_v50, 2102212464  ;;  %vm797_vm2 = vcmp.lt.s32.totalorder %v2385_v11, 1 }
  0xa3   :  { %v2472_v15 = vadd.f32 %v133_v55, %v102_v3  ;;  %v2484_v27 = vshrl.u32 %v2277_v35, %v2466_v7  ;;  %v976_v3 = vmul.u32 %v972_v38, %v970_v36  ;;  %vm981_vm10 = vc.u32 %v973_v61, %v977_v14 }
  0xa4   :  { %v996_v4 = vmul.u32 %v994_v41, %v969_v32  ;;  %v983_v13 = vadd.s32 %v977_v14, %v973_v61  ;;  %v997_v23 = vmul.u32 %v993_v56, %v970_v36  ;;  %vm799_vm3 = vcmp.lt.s32.totalorder %v2385_v11, 3 }
  0xa5   :  { %3426 = vst [vmem:[#allocation3_spill] sm:$0xff] %v2472_v15  ;;  %v148_v34 = vand.u32 2139095040, %v2472_v15 }
  0xa6   :  { %v999_v24 = vshll.u32 %v996_v4, 16  ;;  %vm985_vm12 = vc.u32 %v983_v13, %v979_v6  ;;  %v1001_v61 = vshll.u32 %v997_v23, 16 }
  0xa7   :  { %v149_v42 = vshrl.u32 %v148_v34, 23  ;;  %v115_v45 = vpop.permute.xlu1 %114  ;;  %v995_v34 = vmul.u32 %v993_v56, %v969_v32  ;;  %v986_v38 = vsel %vm985_vm12, 1, %v3411_v1  ;;  %v980_v56 = vshrl.u32 %v975_v51, 16 }
  0xa8   :  { %v134_v55 = vmul.f32 %v115_v45, %v2346_v17  ;;  %v982_v17 = vsel %vm981_vm10, 1, %v3411_v1  ;;  %v1000_v51 = vshrl.u32 %v996_v4, 16 }
  0xa9   :  { %v2169_v59 = vadd.s32 4294967169, %v149_v42  ;;  %v984_v31 = vadd.s32 %v982_v17, %v976_v3  ;;  %vm1003_vm13 = vc.u32 %v995_v34, %v999_v24  ;;  %v1005_v53 = vadd.s32 %v999_v24, %v995_v34 }
  0xaa   :  { %v2512_v16 = vadd.f32 %v134_v55, %v2401_v33  ;;  %v998_v55 = vmul.u32 %v994_v41, %v970_v36  ;;  %v1004_v14 = vsel %vm1003_vm13, 1, %v3411_v1  ;;  %v2524_v3 = vsub.s32 32, %v2509_v0 }
  0xab   :  { %v155_v5 = vadd.s32 1, %v2169_v59  ;;  %v988_v45 = vadd.s32 %v986_v38, %v984_v31  ;;  %vm1007_vm14 = vc.u32 %v1005_v53, %v1001_v61  ;;  %v2560_v4 = vadd.s32 %v1005_v53, %v1001_v61 }
  0xac   :  { %v303_v20 = vand.u32 2139095040, %v2512_v16  ;;  %v1006_v36 = vadd.s32 %v1004_v14, %v998_v55  ;;  %v1008_v17 = vsel %vm1007_vm14, 1, %v3411_v1  ;;  %v639_v55 = vshll.u32 %v3400_v22, %v2509_v0 }
  0xad   :  { %vm156_vm11 = vcmp.gt.s32.totalorder %v155_v5, 0  ;;  %v989_v6 = vadd.s32 %v988_v45, %v978_v39  ;;  %v783_v39 = vshrl.u32 %v3409_v19, %v2389_v18  ;;  %v637_v45 = vshrl.u32 %v3400_v22, %v2524_v3 }
  0xae   :  { %v2516_v37 = vsel %vm156_vm11, %v155_v5, 0  ;;  %v304_v33 = vshrl.u32 %v303_v20, 23  ;;  %v956_v20 = vsel %vm952_vm4, %v936_v47, %v2414_v43  ;;  %v1010_v24 = vadd.s32 %v1008_v17, %v1006_v36 }
  0xaf   :  { %v2520_v42 = vand.u32 31, %v2516_v37  ;;  %v2544_v50 = vadd.s32 %v989_v6, %v980_v56  ;;  %v636_v43 = vshll.u32 %v3402_v28, %v2509_v0  ;;  %v640_v14 = vshrl.u32 %v2277_v35, %v2524_v3 }
  0xb0   :  { %v2172_v59 = vadd.s32 4294967169, %v304_v33  ;;  %v958_v33 = vsel %vm954_vm6, %v2416_v44, %v957_v49  ;;  %v1011_v38 = vadd.s32 %v1010_v24, %v1000_v51  ;;  %v782_v44 = vshll.u32 %v3406_v25, %v2377_v2 }
  0xb1   :  { %3427 = vst [vmem:[#allocation4_spill] sm:$0xff] %v2520_v42  ;;  %v2527_v32 = vsub.s32 32, %v2520_v42  ;;  %v2534_v41 = vshll.u32 %v3400_v22, %v2520_v42  ;;  %v959_v53 = vsel %vm953_vm7, %v956_v20, %v958_v33  ;;  %vm1015_vm0 = vc.u32 %v2544_v50, %v2560_v4 }
  0xb2   :  { %v310_v5 = vadd.s32 1, %v2172_v59  ;;  %v1002_v59 = vshrl.u32 %v997_v23, 16  ;;  %v784_v56 = vor.u32 %v783_v39, %v782_v44  ;;  %v785_v23 = vshll.u32 %v3409_v19, %v2377_v2 }
  0xb3   :  { %3428 = vst [vmem:[#allocation5_spill] sm:$0xff] %v2527_v32  ;;  %v2538_v13 = vshrl.u32 %v2277_v35, %v2527_v32  ;;  %v788_v36 = vshll.u32 %v3404_v21, %v2377_v2  ;;  %v789_v20 = vshrl.u32 %v3402_v28, %v2389_v18  ;;  %v482_v17 = vshrl.u32 %v3400_v22, %v2466_v7 }
  0xb4   :  { %3429 = vst [vmem:[#allocation6_spill] sm:$0xff] %v2534_v41  ;;  %vm311_vm15 = vcmp.gt.s32.totalorder %v310_v5, 0  ;;  %v1012_v61 = vadd.s32 %v1011_v38, %v1002_v59  ;;  %v1013_v51 = vmul.u32 %v2380_v8, %v959_v53  ;;  %v811_v8 = vsel %vm799_vm3, %v2461_v12, %v2504_v52 }
  0xb5   :  { %3430 = vst [vmem:[#allocation7_spill] sm:$0xff] %v2538_v13  ;;  %v2548_v34 = vsel %vm311_vm15, %v310_v5, 0  ;;  %v786_v5 = vshrl.u32 %v3404_v21, %v2389_v18  ;;  %v790_v38 = vor.u32 %v789_v20, %v788_v36  ;;  %v2612_v59 = vshll.u32 %v773_v9, 8 }
  0xb6   :  { %v2558_v47 = vand.u32 31, %v2548_v34  ;;  %v1016_v24 = vadd.s32 1, %v1012_v61  ;;  %v2614_v44 = vor.u32 %v637_v45, %v636_v43  ;;  %v641_v53 = vor.u32 %v640_v14, %v639_v55 }
  0xb7   :  { %v787_v33 = vor.u32 %v786_v5, %v785_v23  ;;  %v481_v23 = vshll.u32 %v3402_v28, %v2440_v60  ;;  %vm798_vm4 = vcmp.lt.s32.totalorder %v2385_v11, 2  ;;  %v807_v12 = vsel %vm799_vm3, %v790_v38, %v2500_v54 }
  0xb8   :  { %3431 = vst [vmem:[#allocation8_spill] sm:$0xff] %v2558_v47  ;;  %v2571_v49 = vsub.s32 32, %v2558_v47  ;;  %v2584_v6 = vshll.u32 %v3400_v22, %v2558_v47  ;;  %v1017_v2 = vsel %vm1015_vm0, %v1016_v24, %v1012_v61  ;;  %v2619_v61 = vshrl.u32 %v2433_v58, 5 }
  0xb9   :  { %v1018_v5 = vadd.s32 %v1017_v2, %v1013_v51  ;;  %v809_v62 = vsel %vm797_vm2, %v787_v33, %v790_v38  ;;  %v2627_v9 = vor.u32 %v482_v17, %v481_v23  ;;  %v814_v58 = vand.u32 65535, %v2612_v59 }
  0xba   :  { %3432 = vst [vmem:[#allocation9_spill] sm:$0xff] %v2571_v49  ;;  %v2588_v10 = vshrl.u32 %v2277_v35, %v2571_v49  ;;  %v805_v35 = vsel %vm797_vm2, %v784_v56, %v787_v33  ;;  %v812_v45 = vsel %vm798_vm4, %v809_v62, %v811_v8  ;;  %v815_v55 = vshrl.u32 %v2612_v59, 16 }
  0xbb   :  { %v1019_v52 = vadd.s32 536870912, %v1018_v5  ;;  %v808_v43 = vsel %vm798_vm4, %v805_v35, %v807_v12  ;;  %v816_v14 = vand.u32 65535, %v812_v45  ;;  %v817_v36 = vshrl.u32 %v812_v45, 16 }
  0xbc   :  { %v2638_v54 = vsel %vm645_vm1, %v2614_v44, 920167782  ;;  %v839_v17 = vshrl.u32 %v808_v43, 16  ;;  %vm490_vm5 = vcmp.lt.s32.totalorder %v2619_v61, 4  ;;  %v802_v51 = vsel %vm800_vm9, %v790_v38, 2102212464 }
  0xbd   :  { %v2640_v20 = vshrl.u32 %v1019_v52, 30  ;;  %v819_v24 = vmul.u32 %v817_v36, %v814_v58  ;;  %v820_v2 = vmul.u32 %v816_v14, %v815_v55  ;;  %v781_v8 = vshrl.u32 %v3406_v25, %v2389_v18 }
  0xbe   :  { %v838_v23 = vand.u32 65535, %v808_v43  ;;  %v841_v12 = vmul.u32 %v839_v17, %v814_v58  ;;  %v2650_v62 = vsel %vm645_vm1, %v641_v53, 1326507024  ;;  %v2655_v52 = vsel %vm490_vm5, %v2627_v9, 920167782 }
  0xbf   :  { %v1021_v35 = vshll.u32 %v2640_v20, 30  ;;  %v818_v45 = vmul.u32 %v816_v14, %v814_v58  ;;  %v822_v38 = vshll.u32 %v819_v24, 16  ;;  %v801_v39 = vsel %vm797_vm2, %v781_v8, %v784_v56 }
  0xc0   :  { %v803_v18 = vsel %vm799_vm3, %v787_v33, %v802_v51  ;;  %v821_v43 = vmul.u32 %v817_v36, %v815_v55  ;;  %v824_v22 = vshll.u32 %v820_v2, 16  ;;  %v844_v40 = vshll.u32 %v841_v12, 16 }
  0xc1   :  { %v2657_v31 = vsub.s32 %v1018_v5, %v1021_v35  ;;  %vm826_vm6 = vc.u32 %v818_v45, %v822_v38  ;;  %v828_v53 = vadd.s32 %v822_v38, %v818_v45  ;;  %v842_v21 = vmul.u32 %v838_v23, %v815_v55 }
  0xc2   :  { %v827_v14 = vsel %vm826_vm6, 1, %v3411_v1  ;;  %v1014_v5 = vadd.s32 %v2560_v4, %v2544_v50  ;;  %v840_v56 = vmul.u32 %v838_v23, %v814_v58  ;;  %v2671_v36 = vsel %vm798_vm4, %v801_v39, %v803_v18 }
  0xc3   :  { %vm1023_vm7 = vcmp.lt.s32.totalorder %v2657_v31, 0  ;;  %v1024_v28 = vsub.s32 0, %v2657_v31  ;;  %v829_v35 = vadd.s32 %v827_v14, %v821_v43  ;;  %vm830_vm8 = vc.u32 %v828_v53, %v824_v22 }
  0xc4   :  { %v823_v51 = vshrl.u32 %v819_v24, 16  ;;  %v3408_v8 = vand.u32 2147483647, %v2361_v48  ;;  %vm922_vm9 = vcmp.lt.s32.totalorder %v2352_v29, 0  ;;  %v831_v38 = vsel %vm830_vm8, 1, %v3411_v1 }
  0xc5   :  { %v1025_v33 = vsel %vm1023_vm7, %v1024_v28, %v2657_v31  ;;  %v843_v25 = vmul.u32 %v839_v17, %v815_v55  ;;  %vm848_vm10 = vc.u32 %v840_v56, %v844_v40  ;;  %v833_v50 = vadd.s32 %v831_v38, %v829_v35 }
  0xc6   :  { %v1026_v45 = vclz %v1025_v33  ;;  %v846_v4 = vshll.u32 %v842_v21, 16  ;;  %v849_v22 = vsel %vm848_vm10, 1, %v3411_v1  ;;  %v850_v58 = vadd.s32 %v844_v40, %v840_v56 }
  0xc7   :  { %v1044_v11 = vsub.s32 4, %v2640_v20  ;;  %v851_v39 = vadd.s32 %v849_v22, %v843_v25  ;;  %v858_v24 = vmul.u32 %v2612_v59, %v2671_v36  ;;  %v825_v23 = vshrl.u32 %v820_v2, 16 }
  0xc8   :  { %v2185_v28 = vadd.s32 4294967294, %v1026_v45  ;;  %v834_v18 = vadd.s32 %v833_v50, %v823_v51  ;;  %vm852_vm11 = vc.u32 %v850_v58, %v846_v4  ;;  %v617_v43 = vand.u32 8388607, %v3408_v8 }
  0xc9   :  { %v845_v55 = vshrl.u32 %v841_v12, 16  ;;  %v847_v17 = vshrl.u32 %v842_v21, 16  ;;  %v853_v53 = vsel %vm852_vm11, 1, %v3411_v1  ;;  %v2683_v40 = vadd.s32 %v850_v58, %v846_v4 }
  0xca   :  { %vm2186_vm12 = vcmp.lt.s32.totalorder %v2185_v28, 0  ;;  %v855_v35 = vadd.s32 %v853_v53, %v851_v39  ;;  %v628_v25 = vshrl.u32 %v3409_v19, %v2524_v3  ;;  %vm2689_vm13 = vcmp.le.f32.partialorder %v920_v46, 0.7853982 }
  0xcb   :  { %v1029_v14 = vsel %vm2186_vm12, 0, %v2185_v28  ;;  %v2693_v33 = vadd.s32 %v834_v18, %v825_v23  ;;  %v3435_v21 = vmov 683565275   ;;  %v618_v45 = vor.u32 8388608, %v617_v43 }
  0xcc   :  { %v1030_v2 = vsub.s32 32, %v1029_v14  ;;  %v1034_v56 = vsub.s32 4294967266, %v1029_v14  ;;  %v627_v12 = vshll.u32 %v3435_v21, %v2509_v0  ;;  %v1031_v36 = vshll.u32 %v2657_v31, %v1029_v14 }
  0xcd   :  { %v856_v51 = vadd.s32 %v855_v35, %v845_v55  ;;  %v630_v38 = vshll.u32 %v3409_v19, %v2509_v0  ;;  %v3436_v22 = vmov 2131351028   ;;  %v1045_v28 = vsel %vm922_vm9, %v1044_v11, %v2640_v20 }
  0xce   :  { %v1032_v50 = vshrl.u32 %v1014_v5, %v1030_v2  ;;  %v1035_v4 = vadd.s32 127, %v1034_v56  ;;  %v2700_v46 = vor.u32 %v628_v25, %v627_v12  ;;  %v631_v58 = vshrl.u32 %v3436_v22, %v2524_v3 }
  0xcf   :  { %v857_v39 = vadd.s32 %v856_v51, %v847_v17  ;;  %v633_v31 = vshll.u32 %v3436_v22, %v2509_v0  ;;  %v3437_v23 = vmov 2102212464   ;;  %vm860_vm14 = vc.u32 %v2693_v33, %v2683_v40 }
  0xd0   :  { %v634_v18 = vshrl.u32 %v3437_v23, %v2524_v3  ;;  %v1033_v43 = vor.u32 %v1032_v50, %v1031_v36  ;;  %v1036_v55 = vshll.u32 %v1035_v4, 23  ;;  %v632_v5 = vor.u32 %v631_v58, %v630_v38 }
  0xd1   :  { %v861_v53 = vadd.s32 1, %v857_v39  ;;  %vm642_vm15 = vcmp.lt.s32.totalorder %v2507_v57, 1  ;;  %vm644_vm0 = vcmp.lt.s32.totalorder %v2507_v57, 3  ;;  %v2722_v17 = vshll.u32 %v618_v45, 8 }
  0xd2   :  { %v635_v14 = vor.u32 %v634_v18, %v633_v31  ;;  %v1037_v20 = vor.u32 4788187, %v1036_v55  ;;  %v650_v0 = vsel %vm642_vm15, %v2700_v46, %v632_v5  ;;  %v656_v11 = vsel %vm644_vm0, %v2614_v44, %v2650_v62 }
  0xd3   :  { %v3438_v35 = vor.u32 %v2484_v27, %v2480_v26  ;;  %v862_v2 = vsel %vm860_vm14, %v861_v53, %v857_v39  ;;  %v1040_v51 = vcvt.s32.f32 %v1033_v43  ;;  %vm643_vm2 = vcmp.lt.s32.totalorder %v2507_v57, 2 }
  0xd4   :  { %v652_v56 = vsel %vm644_vm0, %v635_v14, %v2638_v54  ;;  %v654_v12 = vsel %vm642_vm15, %v632_v5, %v635_v14  ;;  %v1038_v36 = vand.u32 2147483647, %v1037_v20  ;;  %v863_v44 = vadd.s32 %v862_v2, %v858_v24 }
  0xd5   :  { %v2729_v25 = vsel %vm490_vm5, %v3438_v35, 1326507024  ;;  %v2739_v26 = vsel %vm2689_vm13, 0, %v1045_v28  ;;  %v2743_v27 = vsel %vm643_vm2, %v650_v0, %v652_v56  ;;  %v657_v62 = vsel %vm643_vm2, %v654_v12, %v656_v11 }
  0xd6   :  { %3439 = vst [vmem:[#allocation10_spill] sm:$0xff] %v2739_v26  ;;  %v659_v54 = vand.u32 65535, %v2722_v17  ;;  %v1041_v45 = vmul.f32 %v1040_v51, %v1038_v36  ;;  %v864_v38 = vadd.s32 536870912, %v863_v44  ;;  %v661_v50 = vand.u32 65535, %v657_v62 }
  0xd7   :  { %v662_v4 = vshrl.u32 %v657_v62, 16  ;;  %v2750_v24 = vshll.u32 %v3437_v23, %v2520_v42  ;;  %v3440_v58 = vmov 920167782   ;;  %v2757_v39 = vshrl.u32 %v2548_v34, 5 }
  0xd8   :  { %v2754_v28 = vshrl.u32 %v3440_v58, %v2527_v32  ;;  %v660_v31 = vshrl.u32 %v2722_v17, 16  ;;  %v2762_v18 = vshll.u32 %v3437_v23, %v2558_v47  ;;  %v1042_v43 = vxor.u32 2147483648, %v1041_v45 }
  0xd9   :  { %v2764_v55 = vshrl.u32 %v864_v38, 30  ;;  %v664_v53 = vmul.u32 %v662_v4, %v659_v54  ;;  %v2768_v20 = vshrl.u32 %v3440_v58, %v2571_v49  ;;  %v2771_v0 = vand.u32 3, %v2739_v26 }
  0xda   :  { %v2773_v11 = vmul.u32 %v661_v50, %v660_v31  ;;  %v684_v34 = vshrl.u32 %v2743_v27, 16  ;;  %v1043_v35 = vsel %vm922_vm9, %v1042_v43, %v1041_v45  ;;  %v663_v56 = vmul.u32 %v661_v50, %v659_v54 }
  0xdb   :  { %v866_v2 = vshll.u32 %v2764_v55, 30  ;;  %v667_v12 = vshll.u32 %v664_v53, 16  ;;  %v2782_v36 = vsel %vm2689_vm13, %v2352_v29, %v1043_v35  ;;  %v626_v51 = vshrl.u32 %v3435_v21, %v2524_v3 }
  0xdc   :  { %v647_v62 = vsel %vm645_vm1, %v635_v14, 2102212464  ;;  %v683_v38 = vand.u32 65535, %v2743_v27  ;;  %v1048_v45 = vmul.f32 %v2782_v36, %v2782_v36  ;;  %v666_v50 = vmul.u32 %v662_v4, %v660_v31 }
  0xdd   :  { %v2791_v58 = vsub.s32 %v863_v44, %v866_v2  ;;  %vm671_vm3 = vc.u32 %v663_v56, %v667_v12  ;;  %v669_v43 = vshll.u32 %v2773_v11, 16  ;;  %v673_v35 = vadd.s32 %v667_v12, %v663_v56 }
  0xde   :  { %v672_v59 = vsel %vm671_vm3, 1, %v3411_v1  ;;  %v2795_v8 = vmul.u32 %v684_v34, %v659_v54  ;;  %v1049_v3 = vmul.f32 -0.001358992, %v1048_v45  ;;  %v1056_v19 = vmul.f32 -0.00019511016, %v1048_v45 }
  0xdf   :  { %vm868_vm1 = vcmp.lt.s32.totalorder %v2791_v58, 0  ;;  %v869_v14 = vsub.s32 0, %v2791_v58  ;;  %v646_v44 = vsel %vm642_vm15, %v626_v51, %v2700_v46  ;;  %v648_v27 = vsel %vm644_vm0, %v632_v5, %v647_v62 }
  0xe0   :  { %v674_v4 = vadd.s32 %v672_v59, %v666_v50  ;;  %vm675_vm4 = vc.u32 %v673_v35, %v669_v43  ;;  %v1050_v2 = vadd.f32 0.041655596, %v1049_v3  ;;  %v1057_v1 = vadd.f32 0.008332121, %v1056_v19 }
  0xe1   :  { %v870_v56 = vsel %vm868_vm1, %v869_v14, %v2791_v58  ;;  %v3441_v12 = vmov 0   ;;  %v668_v32 = vshrl.u32 %v664_v53, 16  ;;  %v685_v15 = vmul.u32 %v683_v38, %v659_v54 }
  0xe2   :  { %v676_v26 = vsel %vm675_vm4, 1, %v3441_v12  ;;  %v871_v42 = vclz %v870_v56  ;;  %v687_v41 = vmul.u32 %v683_v38, %v660_v31  ;;  %v1051_v13 = vmul.f32 %v1050_v2, %v1048_v45 }
  0xe3   :  { %v1058_v47 = vmul.f32 %v1057_v1, %v1048_v45  ;;  %v678_v49 = vadd.s32 %v676_v26, %v674_v4  ;;  %v689_v46 = vshll.u32 %v2795_v8, 16  ;;  %v859_v5 = vadd.s32 %v2683_v40, %v2693_v33 }
  0xe4   :  { %v2182_v51 = vadd.s32 4294967294, %v871_v42  ;;  %v2811_v19 = vsel %vm643_vm2, %v646_v44, %v648_v27  ;;  %v670_v62 = vshrl.u32 %v2773_v11, 16  ;;  %v1052_v50 = vadd.f32 -0.4999988, %v1051_v13 }
  0xe5   :  { %v1059_v43 = vadd.f32 -0.16666654, %v1058_v47  ;;  %vm2000_vm6 = vcmp.eq.s32.totalorder %v2771_v0, 2  ;;  %v679_v54 = vadd.s32 %v678_v49, %v668_v32  ;;  %vm693_vm7 = vc.u32 %v685_v15, %v689_v46 }
  0xe6   :  { %vm1997_vm8 = vcmp.eq.s32.totalorder %v2771_v0, 0  ;;  %vm2183_vm9 = vcmp.lt.s32.totalorder %v2182_v51, 0  ;;  %v688_v1 = vmul.u32 %v684_v34, %v660_v31  ;;  %v694_v26 = vsel %vm693_vm7, 1, %v3441_v12 }
  0xe7   :  { %v695_v40 = vadd.s32 %v689_v46, %v685_v15  ;;  %v1053_v42 = vmul.f32 %v1052_v50, %v1048_v45  ;;  %v1060_v33 = vmul.f32 %v1059_v43, %v1048_v45  ;;  %vm1996_vm10 = vcmp.lt.s32.totalorder %v2771_v0, 2 }
  0xe8   :  { %v874_v57 = vsel %vm2183_vm9, 0, %v2182_v51  ;;  %v691_v53 = vshll.u32 %v687_v41, 16  ;;  %vm1063_vm11 = vweird.f32 %v2352_v29  ;;  %v696_v11 = vadd.s32 %v694_v26, %v688_v1 }
  0xe9   :  { %v875_v13 = vsub.s32 32, %v874_v57  ;;  %v879_v47 = vsub.s32 4294967266, %v874_v57  ;;  %v455_v32 = vand.u32 2147483647, %v2373_v63  ;;  %v2820_v49 = vadd.f32 1.0, %v1053_v42 }
  0xea   :  { %v1061_v38 = vadd.f32 1.0, %v1060_v33  ;;  %v2822_v31 = vadd.s32 %v679_v54, %v670_v62  ;;  %vm697_vm12 = vc.u32 %v695_v40, %v691_v53  ;;  %vm767_vm13 = vcmp.lt.s32.totalorder %v2354_v30, 0 }
  0xeb   :  { %v876_v15 = vshll.u32 %v2791_v58, %v874_v57  ;;  %v877_v34 = vshrl.u32 %v859_v5, %v875_v13  ;;  %v880_v45 = vadd.s32 127, %v879_v47  ;;  %v698_v59 = vsel %vm697_vm12, 1, %v3441_v12 }
  0xec   :  { %v2828_v35 = vmul.f32 %v1061_v38, %v2782_v36  ;;  %v1071_v3 = vxor.u32 2147483648, %v2820_v49  ;;  %v690_v14 = vshrl.u32 %v2795_v8, 16  ;;  %v700_v44 = vadd.s32 %v698_v59, %v696_v11 }
  0xed   :  { %v878_v27 = vor.u32 %v877_v34, %v876_v15  ;;  %v881_v4 = vshll.u32 %v880_v45, 23  ;;  %v2832_v2 = vadd.s32 %v695_v40, %v691_v53  ;;  %v703_v56 = vmul.u32 %v2722_v17, %v2811_v19 }
  0xee   :  { %v1068_v58 = vxor.u32 2147483648, %v2828_v35  ;;  %v692_v46 = vshrl.u32 %v687_v41, 16  ;;  %v701_v5 = vadd.s32 %v700_v44, %v690_v14  ;;  %v462_v36 = vand.u32 8388607, %v455_v32 }
  0xef   :  { %v2002_v8 = vsel %vm2000_vm6, %v1071_v3, %v2828_v35  ;;  %v3442_v51 = vand.u32 2147483647, %v2354_v30  ;;  %v882_v17 = vor.u32 4788187, %v881_v4  ;;  %v889_v19 = vsub.s32 4, %v2764_v55 }
  0xf0   :  { %vm705_vm15 = vc.u32 %v2822_v31, %v2832_v2  ;;  %v1999_v41 = vsel %vm1997_vm8, %v2820_v49, %v1068_v58  ;;  %v885_v50 = vcvt.s32.f32 %v878_v27  ;;  %v702_v43 = vadd.s32 %v701_v5, %v692_v46 }
  0xf1   :  { %vm2846_vm14 = vcmp.le.f32.partialorder %v3442_v51, 0.7853982  ;;  %v3445_v54 = vmov 2475754826   ;;  %v2003_v26 = vsel %vm1996_vm10, %v1999_v41, %v2002_v8  ;;  %v883_v40 = vand.u32 2147483647, %v882_v17 }
  0xf2   :  { %v473_v1 = vshrl.u32 %v3445_v54, %v2466_v7  ;;  %v472_v42 = vshll.u32 %v3435_v21, %v2440_v60  ;;  %v476_v33 = vshrl.u32 %v3436_v22, %v2466_v7  ;;  %v2004_v57 = vsel %vm1063_vm11, nan, %v2003_v26 }
  0xf3   :  { %v706_v53 = vadd.s32 1, %v702_v43  ;;  %v463_v13 = vor.u32 8388608, %v462_v36  ;;  %v475_v47 = vshll.u32 %v3445_v54, %v2440_v60  ;;  %v2871_v11 = vshrl.u32 %v2516_v37, 5  ;;  %2089 = vmatpush.msrb.mxu0 %v2004_v57  ;;  %2219 = vmatpush.msra.mxu1 %v2004_v57 }
  0xf4   :  { %v886_v0 = vmul.f32 %v885_v50, %v883_v40  ;;  %v478_v38 = vshll.u32 %v3436_v22, %v2440_v60  ;;  %v479_v15 = vshrl.u32 %v3437_v23, %v2466_v7  ;;  %2220 = vmatpush.msra.mxu3 %v2004_v57  ;;  %v890_v34 = vsel %vm767_vm13, %v889_v19, %v2764_v55 }
  0xf5   :  { %v707_v45 = vsel %vm705_vm15, %v706_v53, %v702_v43  ;;  %v474_v37 = vor.u32 %v473_v1, %v472_v42  ;;  %v2883_v59 = vor.u32 %v476_v33, %v475_v47  ;;  %vm489_vm0 = vcmp.lt.s32.totalorder %v2619_v61, 3 }
  0xf6   :  { %v887_v14 = vxor.u32 2147483648, %v886_v0  ;;  %v708_v44 = vadd.s32 %v707_v45, %v703_v56  ;;  %v2885_v27 = vor.u32 %v479_v15, %v478_v38  ;;  %v2890_v60 = vor.u32 %v2754_v28, %v2750_v24 }
  0xf7   :  { %vm335_vm2 = vcmp.lt.s32.totalorder %v2757_v39, 4  ;;  %v501_v55 = vsel %vm489_vm0, %v2627_v9, %v2729_v25  ;;  %v2897_v4 = vshll.u32 %v463_v13, 8  ;;  %v2901_v56 = vor.u32 %v2768_v20, %v2762_v18 }
  0xf8   :  { %v888_v46 = vsel %vm767_vm13, %v887_v14, %v886_v0  ;;  %v709_v5 = vadd.s32 536870912, %v708_v44  ;;  %vm487_vm3 = vcmp.lt.s32.totalorder %v2619_v61, 1  ;;  %v2913_v9 = vsel %vm2846_vm14, 0, %v890_v34 }
  0xf9   :  { %v2909_v24 = vsel %vm2846_vm14, %v2354_v30, %v888_v46  ;;  %vm488_vm1 = vcmp.lt.s32.totalorder %v2619_v61, 2  ;;  %v499_v25 = vsel %vm487_vm3, %v2883_v59, %v2885_v27  ;;  %v495_v20 = vsel %vm487_vm3, %v474_v37, %v2883_v59 }
  0xfa   :  { %v893_v28 = vmul.f32 %v2909_v24, %v2909_v24  ;;  %v2922_v18 = vshrl.u32 %v709_v5, 30  ;;  %v502_v36 = vsel %vm488_vm1, %v499_v25, %v501_v55  ;;  %v2930_v8 = vand.u32 65535, %v2897_v4 }
  0xfb   :  { %v2933_v51 = vshrl.u32 %v2897_v4, 16  ;;  %v506_v62 = vand.u32 65535, %v502_v36  ;;  %v507_v17 = vshrl.u32 %v502_v36, 16  ;;  %v497_v43 = vsel %vm489_vm0, %v2885_v27, %v2655_v52 }
  0xfc   :  { %v894_v19 = vmul.f32 -0.001358992, %v893_v28  ;;  %v901_v41 = vmul.f32 -0.00019511016, %v893_v28  ;;  %v711_v50 = vshll.u32 %v2922_v18, 30  ;;  %v3446_v26 = vor.u32 %v2588_v10, %v2584_v6 }
  0xfd   :  { %v2943_v1 = vsel %vm335_vm2, %v2901_v56, 920167782  ;;  %v509_v42 = vmul.u32 %v507_v17, %v2930_v8  ;;  %v510_v33 = vmul.u32 %v506_v62, %v2933_v51  ;;  %v2955_v52 = vand.u32 3, %v2913_v9 }
  0xfe   :  { %v2950_v40 = vsel %vm335_vm2, %v3446_v26, 1326507024  ;;  %v895_v57 = vadd.f32 0.041655596, %v894_v19  ;;  %v902_v53 = vadd.f32 0.008332121, %v901_v41  ;;  %v2957_v13 = vsub.s32 %v708_v44, %v711_v50 }
  0xff   :  { %v471_v47 = vshrl.u32 %v3435_v21, %v2466_v7  ;;  %v498_v6 = vsel %vm488_vm1, %v495_v20, %v497_v43  ;;  %v508_v10 = vmul.u32 %v506_v62, %v2930_v8  ;;  %v512_v0 = vshll.u32 %v509_v42, 16 }
 0x100   :  { %v896_v38 = vmul.f32 %v895_v57, %v893_v28  ;;  %v903_v15 = vmul.f32 %v902_v53, %v893_v28  ;;  %vm713_vm4 = vcmp.lt.s32.totalorder %v2957_v13, 0  ;;  %v714_v34 = vsub.s32 0, %v2957_v13 }
 0x101   :  { %v511_v45 = vmul.u32 %v507_v17, %v2933_v51  ;;  %v514_v14 = vshll.u32 %v510_v33, 16  ;;  %vm516_vm6 = vc.u32 %v508_v10, %v512_v0  ;;  %v518_v44 = vadd.s32 %v512_v0, %v508_v10 }
 0x102   :  { %v897_v55 = vadd.f32 -0.4999988, %v896_v38  ;;  %v904_v46 = vadd.f32 -0.16666654, %v903_v15  ;;  %vm1846_vm7 = vcmp.eq.s32.totalorder %v2955_v52, 2  ;;  %v715_v7 = vsel %vm713_vm4, %v714_v34, %v2957_v13 }
 0x103   :  { %v517_v5 = vsel %vm516_vm6, 1, %v3441_v12  ;;  %vm1843_vm8 = vcmp.eq.s32.totalorder %v2955_v52, 0  ;;  %v704_v25 = vadd.s32 %v2832_v2, %v2822_v31  ;;  %v716_v20 = vclz %v715_v7 }
 0x104   :  { %v2975_v36 = vsel %vm487_vm3, %v471_v47, %v474_v37  ;;  %v300_v62 = vand.u32 2147483647, %v2512_v16  ;;  %v898_v17 = vmul.f32 %v897_v55, %v893_v28  ;;  %v905_v19 = vmul.f32 %v904_v46, %v893_v28 }
 0x105   :  { %vm1842_vm9 = vcmp.lt.s32.totalorder %v2955_v52, 2  ;;  %v519_v41 = vadd.s32 %v517_v5, %v511_v45  ;;  %vm520_vm10 = vc.u32 %v518_v44, %v514_v14  ;;  %vm908_vm12 = vweird.f32 %v2354_v30  ;;  %v2019_v30 = vld [vmem:[%s3395_s3] sm:$0xff] }
 0x106   :  { %v2179_v50 = vadd.s32 4294967294, %v716_v20  ;;  %v521_v43 = vsel %vm520_vm10, 1, %v3441_v12  ;;  %v528_v26 = vand.u32 65535, %v498_v6  ;;  %v529_v31 = vshrl.u32 %v498_v6, 16 }
 0x107   :  { %v2981_v2 = vadd.f32 1.0, %v898_v17  ;;  %v906_v57 = vadd.f32 1.0, %v905_v19  ;;  %v513_v37 = vshrl.u32 %v509_v42, 16  ;;  %v523_v53 = vadd.s32 %v521_v43, %v519_v41 }
 0x108   :  { %vm2180_vm13 = vcmp.lt.s32.totalorder %v2179_v50, 0  ;;  %v492_v28 = vsel %vm490_vm5, %v2885_v27, 2102212464  ;;  %v531_v47 = vmul.u32 %v529_v31, %v2930_v8  ;;  %v532_v10 = vmul.u32 %v528_v26, %v2933_v51 }
 0x109   :  { %v2989_v0 = vmul.f32 %v906_v57, %v2909_v24  ;;  %v916_v38 = vxor.u32 2147483648, %v2981_v2  ;;  %v719_v6 = vsel %vm2180_vm13, 0, %v2179_v50  ;;  %v524_v15 = vadd.s32 %v523_v53, %v513_v37 }
 0x10a   :  { %v720_v34 = vsub.s32 32, %v719_v6  ;;  %v724_v45 = vsub.s32 4294967266, %v719_v6  ;;  %v515_v42 = vshrl.u32 %v510_v33, 16  ;;  %v530_v14 = vmul.u32 %v528_v26, %v2930_v8 }
 0x10b   :  { %v913_v44 = vxor.u32 2147483648, %v2989_v0  ;;  %v721_v27 = vshll.u32 %v2957_v13, %v719_v6  ;;  %v533_v55 = vmul.u32 %v529_v31, %v2933_v51  ;;  %v534_v46 = vshll.u32 %v531_v47, 16 }
 0x10c   :  { %v1848_v24 = vsel %vm1846_vm7, %v916_v38, %v2989_v0  ;;  %vm612_vm5 = vcmp.lt.s32.totalorder %v2361_v48, 0  ;;  %v722_v7 = vshrl.u32 %v704_v25, %v720_v34  ;;  %v725_v5 = vadd.s32 127, %v724_v45 }
 0x10d   :  { %v525_v33 = vadd.s32 %v524_v15, %v515_v42  ;;  %v1845_v8 = vsel %vm1843_vm8, %v2981_v2, %v913_v44  ;;  %v536_v13 = vshll.u32 %v532_v10, 16  ;;  %vm538_vm14 = vc.u32 %v530_v14, %v534_v46 }
 0x10e   :  { %v540_v51 = vadd.s32 %v534_v46, %v530_v14  ;;  %v1849_v20 = vsel %vm1842_vm9, %v1845_v8, %v1848_v24  ;;  %v723_v17 = vor.u32 %v722_v7, %v721_v27  ;;  %v726_v19 = vshll.u32 %v725_v5, 23  ;;  %v3447_v27 = vld [vmem:[#allocation9_spill] sm:$0xff]  ;;  %v3448_v46 = vld [vmem:[#allocation8_spill] sm:$0xff] }
 0x10f   :  { %v539_v41 = vsel %vm538_vm14, 1, %v3441_v12  ;;  %v1850_v25 = vsel %vm908_vm12, nan, %v1849_v20  ;;  %v734_v31 = vsub.s32 4, %v2922_v18  ;;  %v493_v52 = vsel %vm489_vm0, %v2883_v59, %v492_v28 }
 0x110   :  { %v541_v50 = vadd.s32 %v539_v41, %v533_v55  ;;  %vm542_vm15 = vc.u32 %v540_v51, %v536_v13  ;;  %v544_v43 = vadd.s32 %v540_v51, %v536_v13  ;;  %2090 = vmatpush.msrb.mxu0 %v1850_v25  ;;  %2221 = vmatpush.msra.mxu1 %v1850_v25  ;;  %v727_v26 = vor.u32 4788187, %v726_v19 }
 0x111   :  { %v543_v57 = vsel %vm542_vm15, 1, %v3441_v12  ;;  %2222 = vmatpush.msra.mxu3 %v1850_v25  ;;  %v535_v37 = vshrl.u32 %v531_v47, 16  ;;  %v730_v34 = vcvt.s32.f32 %v723_v17  ;;  %v537_v45 = vshrl.u32 %v532_v10, 16 }
 0x112   :  { %v545_v53 = vadd.s32 %v543_v57, %v541_v50  ;;  %v3017_v6 = vadd.s32 %v544_v43, %v525_v33  ;;  %vm550_vm3 = vc.u32 %v525_v33, %v544_v43  ;;  %v728_v15 = vand.u32 2147483647, %v727_v26 }
 0x113   :  { %v307_v42 = vand.u32 8388607, %v300_v62  ;;  %v318_v55 = vshrl.u32 %v3445_v54, %v3447_v27  ;;  %v320_v59 = vshll.u32 %v3445_v54, %v3448_v46  ;;  %v321_v28 = vshrl.u32 %v3436_v22, %v3447_v27 }
 0x114   :  { %v546_v14 = vadd.s32 %v545_v53, %v535_v37  ;;  %v731_v47 = vmul.f32 %v730_v34, %v728_v15  ;;  %v317_v24 = vshll.u32 %v3435_v21, %v3448_v46  ;;  %v323_v10 = vshll.u32 %v3436_v22, %v3448_v46 }
 0x115   :  { %v324_v7 = vshrl.u32 %v3437_v23, %v3447_v27  ;;  %v735_v5 = vsel %vm612_vm5, %v734_v31, %v2922_v18  ;;  %v494_v8 = vsel %vm488_vm1, %v2975_v36, %v493_v52  ;;  %v3039_v51 = vor.u32 %v321_v28, %v320_v59 }
 0x116   :  { %v547_v13 = vadd.s32 %v546_v14, %v537_v45  ;;  %v732_v20 = vxor.u32 2147483648, %v731_v47  ;;  %v3041_v17 = vor.u32 %v318_v55, %v317_v24  ;;  %vm334_vm0 = vcmp.lt.s32.totalorder %v2757_v39, 3 }
 0x117   :  { %v325_v19 = vor.u32 %v324_v7, %v323_v10  ;;  %v308_v25 = vor.u32 8388608, %v307_v42  ;;  %vm332_vm4 = vcmp.lt.s32.totalorder %v2757_v39, 1  ;;  %v346_v18 = vsel %vm334_vm0, %v2901_v56, %v2950_v40 }
 0x118   :  { %v551_v41 = vadd.s32 1, %v547_v13  ;;  %v3449_v61 = vand.u32 2147483647, %v2361_v48  ;;  %v733_v36 = vsel %vm612_vm5, %v732_v20, %v731_v47  ;;  %v548_v50 = vmul.u32 %v2897_v4, %v494_v8  ;;  %v3451_v8 = vld [vmem:[#allocation6_spill] sm:$0xff] }
 0x119   :  { %v344_v26 = vsel %vm332_vm4, %v3039_v51, %v325_v19  ;;  %vm333_vm6 = vcmp.lt.s32.totalorder %v2757_v39, 2  ;;  %v340_v37 = vsel %vm332_vm4, %v3041_v17, %v3039_v51  ;;  %v342_v53 = vsel %vm334_vm0, %v325_v19, %v2943_v1 }
 0x11a   :  { %vm611_vm1 = vcmp.le.f32.partialorder %v3449_v61, 0.7853982  ;;  %v552_v57 = vsel %vm550_vm3, %v551_v41, %v547_v13  ;;  %v347_v4 = vsel %vm333_vm6, %v344_v26, %v346_v18  ;;  %v3071_v15 = vshll.u32 %v308_v25, 8 }
 0x11b   :  { %v736_v31 = vsel %vm611_vm1, %v2361_v48, %v733_v36  ;;  %v3058_v52 = vsel %vm611_vm1, 0, %v735_v5  ;;  %v553_v40 = vadd.s32 %v552_v57, %v548_v50  ;;  %v351_v33 = vand.u32 65535, %v347_v4  ;;  %v3450_v5 = vld [vmem:[#allocation7_spill] sm:$0xff] }
 0x11c   :  { %v738_v56 = vmul.f32 %v736_v31, %v736_v31  ;;  %v352_v43 = vshrl.u32 %v347_v4, 16  ;;  %vm180_vm7 = vcmp.lt.s32.totalorder %v2871_v11, 4  ;;  %v3075_v14 = vand.u32 3, %v3058_v52 }
 0x11d   :  { %v554_v42 = vadd.s32 536870912, %v553_v40  ;;  %v349_v55 = vand.u32 65535, %v3071_v15  ;;  %v350_v46 = vshrl.u32 %v3071_v15, 16  ;;  %v343_v1 = vsel %vm333_vm6, %v340_v37, %v342_v53 }
 0x11e   :  { %v739_v34 = vmul.f32 -0.001358992, %v738_v56  ;;  %v746_v45 = vmul.f32 -0.00019511016, %v738_v56  ;;  %v3086_v24 = vsel %vm180_vm7, %v2890_v60, 920167782  ;;  %v3452_v13 = vor.u32 %v3450_v5, %v3451_v8 }
 0x11f   :  { %v3079_v47 = vshrl.u32 %v554_v42, 30  ;;  %v354_v10 = vmul.u32 %v352_v43, %v349_v55  ;;  %v3088_v7 = vmul.u32 %v351_v33, %v350_v46  ;;  %vm1692_vm8 = vcmp.eq.s32.totalorder %v3075_v14, 2 }
 0x120   :  { %v740_v59 = vadd.f32 0.041655596, %v739_v34  ;;  %v747_v28 = vadd.f32 0.008332121, %v746_v45  ;;  %v3095_v20 = vsel %vm180_vm7, %v3452_v13, 1326507024  ;;  %v353_v36 = vmul.u32 %v351_v33, %v349_v55 }
 0x121   :  { %v556_v18 = vshll.u32 %v3079_v47, 30  ;;  %v337_v61 = vsel %vm335_vm2, %v325_v19, 2102212464  ;;  %v357_v50 = vshll.u32 %v354_v10, 16  ;;  %v374_v26 = vshrl.u32 %v343_v1, 16 }
 0x122   :  { %v741_v41 = vmul.f32 %v740_v59, %v738_v56  ;;  %v748_v25 = vmul.f32 %v747_v28, %v738_v56  ;;  %v373_v53 = vand.u32 65535, %v343_v1  ;;  %vm1689_vm9 = vcmp.eq.s32.totalorder %v3075_v14, 0 }
 0x123   :  { %v3101_v4 = vsub.s32 %v553_v40, %v556_v18  ;;  %v356_v34 = vmul.u32 %v352_v43, %v350_v46  ;;  %v359_v45 = vshll.u32 %v3088_v7, 16  ;;  %vm361_vm10 = vc.u32 %v353_v36, %v357_v50 }
 0x124   :  { %v742_v57 = vadd.f32 -0.4999988, %v741_v41  ;;  %v749_v37 = vadd.f32 -0.16666654, %v748_v25  ;;  %v363_v42 = vadd.s32 %v357_v50, %v353_v36  ;;  %vm1688_vm13 = vcmp.lt.s32.totalorder %v3075_v14, 2 }
 0x125   :  { %vm558_vm2 = vcmp.lt.s32.totalorder %v3101_v4, 0  ;;  %v559_v19 = vsub.s32 0, %v3101_v4  ;;  %vm753_vm5 = vweird.f32 %v2361_v48  ;;  %v316_v40 = vshrl.u32 %v3435_v21, %v3447_v27 }
 0x126   :  { %v743_v59 = vmul.f32 %v742_v57, %v738_v56  ;;  %v750_v28 = vmul.f32 %v749_v37, %v738_v56  ;;  %v362_v33 = vsel %vm361_vm10, 1, %v3441_v12  ;;  %vm365_vm14 = vc.u32 %v363_v42, %v359_v45 }
 0x127   :  { %v376_v43 = vmul.u32 %v374_v26, %v349_v55  ;;  %v560_v56 = vsel %vm558_vm2, %v559_v19, %v3101_v4  ;;  %v364_v8 = vadd.s32 %v362_v33, %v356_v34  ;;  %v336_v41 = vsel %vm332_vm4, %v316_v40, %v3041_v17 }
 0x128   :  { %v3112_v1 = vadd.f32 1.0, %v743_v59  ;;  %v751_v5 = vadd.f32 1.0, %v750_v28  ;;  %v561_v13 = vclz %v560_v56  ;;  %v338_v25 = vsel %vm334_vm0, %v3039_v51, %v337_v61 }
 0x129   :  { %v358_v27 = vshrl.u32 %v354_v10, 16  ;;  %v366_v50 = vsel %vm365_vm14, 1, %v3441_v12  ;;  %v377_v57 = vmul.u32 %v373_v53, %v350_v46  ;;  %v375_v34 = vmul.u32 %v373_v53, %v349_v55 }
 0x12a   :  { %v3121_v18 = vmul.f32 %v751_v5, %v736_v31  ;;  %v761_v36 = vxor.u32 2147483648, %v3112_v1  ;;  %v2176_v37 = vadd.s32 4294967294, %v561_v13  ;;  %v368_v45 = vadd.s32 %v366_v50, %v364_v8 }
 0x12b   :  { %v379_v42 = vshll.u32 %v376_v43, 16  ;;  %v360_v17 = vshrl.u32 %v3088_v7, 16  ;;  %v378_v31 = vmul.u32 %v374_v26, %v350_v46  ;;  %v381_v61 = vshll.u32 %v377_v57, 16 }
 0x12c   :  { %v758_v59 = vxor.u32 2147483648, %v3121_v18  ;;  %v1694_v51 = vsel %vm1692_vm8, %v761_v36, %v3121_v18  ;;  %vm2177_vm15 = vcmp.lt.s32.totalorder %v2176_v37, 0  ;;  %v369_v10 = vadd.s32 %v368_v45, %v358_v27  ;;  %v3453_v45 = vld [vmem:[#allocation3_spill] sm:$0xff] }
 0x12d   :  { %vm383_vm3 = vc.u32 %v375_v34, %v379_v42  ;;  %v564_v53 = vsel %vm2177_vm15, 0, %v2176_v37  ;;  %v385_v19 = vadd.s32 %v379_v42, %v375_v34  ;;  %v339_v14 = vsel %vm333_vm6, %v336_v41, %v338_v25  ;;  %v3455_v41 = vld [vmem:[#allocation4_spill] sm:$0xff] }
 0x12e   :  { %v1691_v55 = vsel %vm1689_vm9, %v3112_v1, %v758_v59  ;;  %v384_v28 = vsel %vm383_vm3, 1, %v3441_v12  ;;  %v565_v33 = vsub.s32 32, %v564_v53  ;;  %v566_v46 = vshll.u32 %v3101_v4, %v564_v53 }
 0x12f   :  { %v1695_v40 = vsel %vm1688_vm13, %v1691_v55, %v1694_v51  ;;  %v569_v7 = vsub.s32 4294967266, %v564_v53  ;;  %v370_v5 = vadd.s32 %v369_v10, %v360_v17  ;;  %v386_v56 = vadd.s32 %v384_v28, %v378_v31  ;;  %v3454_v55 = vld [vmem:[#allocation5_spill] sm:$0xff] }
 0x130   :  { %v1696_v26 = vsel %vm753_vm5, nan, %v1695_v40  ;;  %vm387_vm0 = vc.u32 %v385_v19, %v381_v61  ;;  %v567_v8 = vshrl.u32 %v3017_v6, %v565_v33  ;;  %v389_v50 = vadd.s32 %v385_v19, %v381_v61 }
 0x131   :  { %2091 = vmatpush.msrb.mxu0 %v1696_v26  ;;  %2223 = vmatpush.msra.mxu1 %v1696_v26  ;;  %v570_v13 = vadd.s32 127, %v569_v7  ;;  %v388_v27 = vsel %vm387_vm0, 1, %v3441_v12  ;;  %v380_v4 = vshrl.u32 %v376_v43, 16  ;;  %v145_v34 = vand.u32 2147483647, %v3453_v45  ;;  %v30_v43 = vld [vmem:[%s3392_s2 + $0x30] sm:$0xff] }
 0x132   :  { %2224 = vmatpush.msra.mxu3 %v1696_v26  ;;  %v390_v37 = vadd.s32 %v388_v27, %v386_v56  ;;  %v568_v42 = vor.u32 %v567_v8, %v566_v46  ;;  %v3148_v17 = vadd.s32 %v389_v50, %v370_v5  ;;  %vm395_vm4 = vc.u32 %v370_v5, %v389_v50 }
 0x133   :  { %v571_v51 = vshll.u32 %v570_v13, 23  ;;  %v382_v31 = vshrl.u32 %v377_v57, 16  ;;  %v152_v6 = vand.u32 8388607, %v145_v34  ;;  %v163_v61 = vshrl.u32 %v3445_v54, %v3454_v55 }
 0x134   :  { %v391_v10 = vadd.s32 %v390_v37, %v380_v4  ;;  %v579_v39 = vsub.s32 4, %v3079_v47  ;;  %vm2039_vm1 = vcmask 23552   ;;  %v162_v25 = vshll.u32 %v3435_v21, %v3455_v41 }
 0x135   :  { %v572_v53 = vor.u32 4788187, %v571_v51  ;;  %2206 = vmatmul.msk.f32.vlgmr.msra.gmra.mxu0 %vm2039_vm1, %v30_v43  ;;  %v153_v28 = vor.u32 8388608, %v152_v6  ;;  %v165_v19 = vshll.u32 %v3445_v54, %v3455_v41  ;;  %v166_v40 = vshrl.u32 %v3436_v22, %v3454_v55  ;;  %v31_v51 = vld [vmem:[%s3392_s2 + $0x38] sm:$0xff] }
 0x136   :  { %v392_v57 = vadd.s32 %v391_v10, %v382_v31  ;;  %v575_v46 = vcvt.s32.f32 %v568_v42  ;;  %v168_v7 = vshll.u32 %v3436_v22, %v3455_v41  ;;  %v169_v26 = vshrl.u32 %v3437_v23, %v3454_v55 }
 0x137   :  { %v573_v33 = vand.u32 2147483647, %v572_v53  ;;  %v3169_v8 = vor.u32 %v163_v61, %v162_v25  ;;  %v3171_v13 = vor.u32 %v166_v40, %v165_v19  ;;  %vm179_vm6 = vcmp.lt.s32.totalorder %v2871_v11, 3 }
 0x138   :  { %v396_v56 = vadd.s32 1, %v392_v57  ;;  %v393_v54 = vmul.u32 %v3071_v15, %v339_v14  ;;  %v3175_v4 = vor.u32 %v169_v26, %v168_v7  ;;  %v191_v22 = vsel %vm179_vm6, %v2890_v60, %v3095_v20 }
 0x139   :  { %v576_v27 = vmul.f32 %v575_v46, %v573_v33  ;;  %vm3183_vm8 = vcmp.le.f32.partialorder %v455_v32, 0.7853982  ;;  %vm457_vm9 = vcmp.lt.s32.totalorder %v2373_v63, 0  ;;  %v3189_v42 = vshll.u32 %v153_v28, 8 }
 0x13a   :  { %v397_v37 = vsel %vm395_vm4, %v396_v56, %v392_v57  ;;  %v580_v14 = vsel %vm457_vm9, %v579_v39, %v3079_v47  ;;  %vm177_vm10 = vcmp.lt.s32.totalorder %v2871_v11, 1  ;;  %vm178_vm13 = vcmp.lt.s32.totalorder %v2871_v11, 2 }
 0x13b   :  { %v577_v15 = vxor.u32 2147483648, %v576_v27  ;;  %v398_v60 = vadd.s32 %v397_v37, %v393_v54  ;;  %v185_v32 = vsel %vm177_vm10, %v3169_v8, %v3171_v13  ;;  %v187_v20 = vsel %vm179_vm6, %v3175_v4, %v3086_v24 }
 0x13c   :  { %v189_v47 = vsel %vm177_vm10, %v3171_v13, %v3175_v4  ;;  %v194_v10 = vand.u32 65535, %v3189_v42  ;;  %v195_v24 = vshrl.u32 %v3189_v42, 16  ;;  %v3219_v39 = vsel %vm3183_vm8, 0, %v580_v14 }
 0x13d   :  { %v578_v5 = vsel %vm457_vm9, %v577_v15, %v576_v27  ;;  %v399_v50 = vadd.s32 536870912, %v398_v60  ;;  %v192_v31 = vsel %vm178_vm13, %v189_v47, %v191_v22  ;;  %2207 = vmatmul.msk.f32.gmra.mxu0 %vm2039_vm1, %v31_v51  ;;  %v188_v25 = vsel %vm178_vm13, %v185_v32, %v187_v20  ;;  %v32_v22 = vld [vmem:[%s3392_s2 + $0x40] sm:$0xff] }
 0x13e   :  { %v581_v6 = vsel %vm3183_vm8, %v2373_v63, %v578_v5  ;;  %v196_v61 = vand.u32 65535, %v192_v31  ;;  %v197_v53 = vshrl.u32 %v192_v31, 16  ;;  %v3227_v46 = vand.u32 3, %v3219_v39 }
 0x13f   :  { %v583_v43 = vmul.f32 %v581_v6, %v581_v6  ;;  %v3221_v41 = vshrl.u32 %v399_v50, 30  ;;  %v219_v56 = vshrl.u32 %v188_v25, 16  ;;  %v218_v37 = vand.u32 65535, %v188_v25 }
 0x140   :  { %v199_v57 = vmul.u32 %v197_v53, %v194_v10  ;;  %v200_v28 = vmul.u32 %v196_v61, %v195_v24  ;;  %v198_v7 = vmul.u32 %v196_v61, %v194_v10  ;;  %v201_v15 = vmul.u32 %v197_v53, %v195_v24 }
 0x141   :  { %v584_v19 = vmul.f32 -0.001358992, %v583_v43  ;;  %v591_v40 = vmul.f32 -0.00019511016, %v583_v43  ;;  %v401_v33 = vshll.u32 %v3221_v41, 30  ;;  %v3234_v50 = vmul.u32 %v219_v56, %v194_v10 }
 0x142   :  { %v202_v26 = vshll.u32 %v199_v57, 16  ;;  %v204_v14 = vshll.u32 %v200_v28, 16  ;;  %vm1535_vm3 = vcmp.eq.s32.totalorder %v3227_v46, 0  ;;  %vm1538_vm0 = vcmp.eq.s32.totalorder %v3227_v46, 2 }
 0x143   :  { %v585_v27 = vadd.f32 0.041655596, %v584_v19  ;;  %v592_v54 = vadd.f32 0.008332121, %v591_v40  ;;  %v402_v23 = vsub.s32 %v398_v60, %v401_v33  ;;  %v203_v25 = vshrl.u32 %v199_v57, 16 }
 0x144   :  { %vm206_vm2 = vc.u32 %v198_v7, %v202_v26  ;;  %v208_v51 = vadd.s32 %v202_v26, %v198_v7  ;;  %vm1534_vm4 = vcmp.lt.s32.totalorder %v3227_v46, 2  ;;  %v220_v26 = vmul.u32 %v218_v37, %v194_v10 }
 0x145   :  { %v586_v32 = vmul.f32 %v585_v27, %v583_v43  ;;  %v593_v20 = vmul.f32 %v592_v54, %v583_v43  ;;  %vm403_vm14 = vcmp.lt.s32.totalorder %v402_v23, 0  ;;  %v404_v47 = vsub.s32 0, %v402_v23  ;;  %2208 = vmatmul.msk.f32.gmra.mxu0 %vm2039_vm1, %v32_v22 }
 0x146   :  { %v207_v5 = vsel %vm206_vm2, 1, %v3441_v12  ;;  %vm210_vm15 = vc.u32 %v208_v51, %v204_v14  ;;  %vm598_vm8 = vweird.f32 %v2373_v63  ;;  %v222_v22 = vmul.u32 %v218_v37, %v195_v24 }
 0x147   :  { %v587_v31 = vadd.f32 -0.4999988, %v586_v32  ;;  %v594_v61 = vadd.f32 -0.16666654, %v593_v20  ;;  %v405_v19 = vsel %vm403_vm14, %v404_v47, %v402_v23  ;;  %v209_v60 = vadd.s32 %v207_v5, %v201_v15 }
 0x148   :  { %v406_v53 = vclz %v405_v19  ;;  %v211_v7 = vsel %vm210_vm15, 1, %v3441_v12  ;;  %v224_v15 = vshll.u32 %v3234_v50, 16  ;;  %v161_v57 = vshrl.u32 %v3435_v21, %v3454_v55 }
 0x149   :  { %v588_v40 = vmul.f32 %v587_v31, %v583_v43  ;;  %v595_v33 = vmul.f32 %v594_v61, %v583_v43  ;;  %v213_v54 = vadd.s32 %v211_v7, %v209_v60  ;;  %v205_v32 = vshrl.u32 %v200_v28, 16 }
 0x14a   :  { %v2173_v27 = vadd.s32 4294967294, %v406_v53  ;;  %v223_v20 = vmul.u32 %v219_v56, %v195_v24  ;;  %vm228_vm2 = vc.u32 %v220_v26, %v224_v15  ;;  %v226_v60 = vshll.u32 %v222_v22, 16 }
 0x14b   :  { %v3242_v14 = vadd.f32 1.0, %v588_v40  ;;  %v596_v51 = vadd.f32 1.0, %v595_v33  ;;  %v214_v43 = vadd.s32 %v213_v54, %v203_v25  ;;  %v229_v37 = vsel %vm228_vm2, 1, %v3441_v12 }
 0x14c   :  { %vm2174_vm9 = vcmp.lt.s32.totalorder %v2173_v27, 0  ;;  %v230_v55 = vadd.s32 %v224_v15, %v220_v26  ;;  %v182_v25 = vsel %vm180_vm7, %v3175_v4, 2102212464  ;;  %v225_v33 = vshrl.u32 %v3234_v50, 16 }
 0x14d   :  { %v3246_v47 = vmul.f32 %v596_v51, %v581_v6  ;;  %v606_v10 = vxor.u32 2147483648, %v3242_v14  ;;  %v409_v5 = vsel %vm2174_vm9, 0, %v2173_v27  ;;  %v215_v19 = vadd.s32 %v214_v43, %v205_v32 }
 0x14e   :  { %v410_v31 = vsub.s32 32, %v409_v5  ;;  %v414_v61 = vsub.s32 4294967266, %v409_v5  ;;  %v231_v6 = vadd.s32 %v229_v37, %v223_v20  ;;  %v411_v24 = vshll.u32 %v402_v23, %v409_v5 }
 0x14f   :  { %v603_v53 = vxor.u32 2147483648, %v3246_v47  ;;  %v1540_v21 = vsel %vm1538_vm0, %v606_v10, %v3246_v47  ;;  %vm232_vm14 = vc.u32 %v230_v55, %v226_v60  ;;  %v234_v7 = vadd.s32 %v230_v55, %v226_v60 }
 0x150   :  { %v412_v28 = vshrl.u32 %v3148_v17, %v410_v31  ;;  %v415_v56 = vadd.s32 127, %v414_v61  ;;  %v233_v27 = vsel %vm232_vm14, 1, %v3441_v12  ;;  %v181_v50 = vsel %vm177_vm10, %v161_v57, %v3169_v8 }
 0x151   :  { %v1537_v40 = vsel %vm1535_vm3, %v3242_v14, %v603_v53  ;;  %v235_v54 = vadd.s32 %v233_v27, %v231_v6  ;;  %v3271_v15 = vadd.s32 %v234_v7, %v215_v19  ;;  %vm240_vm7 = vc.u32 %v215_v19, %v234_v7 }
 0x152   :  { %v1541_v23 = vsel %vm1534_vm4, %v1537_v40, %v1540_v21  ;;  %v413_v26 = vor.u32 %v412_v28, %v411_v24  ;;  %v416_v17 = vshll.u32 %v415_v56, 23  ;;  %v183_v46 = vsel %vm179_vm6, %v3171_v13, %v182_v25 }
 0x153   :  { %v1542_v4 = vsel %vm598_vm8, nan, %v1541_v23  ;;  %v227_v12 = vshrl.u32 %v222_v22, 16  ;;  %v236_v32 = vadd.s32 %v235_v54, %v225_v33  ;;  %v184_v5 = vsel %vm178_vm13, %v181_v50, %v183_v46 }
 0x154   :  { %2092 = vmatpush.msrb.mxu0 %v1542_v4  ;;  %2225 = vmatpush.msra.mxu1 %v1542_v4  ;;  %v417_v51 = vor.u32 4788187, %v416_v17  ;;  %v420_v20 = vcvt.s32.f32 %v413_v26  ;;  %v238_v21 = vmul.u32 %v3189_v42, %v184_v5  ;;  %vm302_vm10 = vcmp.lt.s32.totalorder %v2512_v16, 0 }
 0x155   :  { %2226 = vmatpush.msra.mxu3 %v1542_v4  ;;  %v237_v37 = vadd.s32 %v236_v32, %v227_v12  ;;  %vm3286_vm6 = vcmp.le.f32.partialorder %v300_v62, 0.7853982  ;;  %v754_v11 = vadd.s32 3, %v3058_v52  ;;  %v424_v42 = vsub.s32 4, %v3221_v41 }
 0x156   :  { %v418_v43 = vand.u32 2147483647, %v417_v51  ;;  %v599_v52 = vadd.s32 3, %v3219_v39 }
 0x157   :  { %v241_v61 = vadd.s32 1, %v237_v37  ;;  %v755_v62 = vand.u32 3, %v754_v11  ;;  %v425_v25 = vsel %vm302_vm10, %v424_v42, %v3221_v41 }
 0x158   :  { %v421_v31 = vmul.f32 %v420_v20, %v418_v43  ;;  %v427_v27 = vsel %vm3286_vm6, 0, %v425_v25  ;;  %v600_v50 = vand.u32 3, %v599_v52 }
 0x159   :  { %v242_v8 = vsel %vm240_vm7, %v241_v61, %v237_v37  ;;  %vm760_vm13 = vcmp.eq.s32.totalorder %v755_v62, 2  ;;  %vm757_vm15 = vcmp.eq.s32.totalorder %v755_v62, 0  ;;  %vm756_vm0 = vcmp.lt.s32.totalorder %v755_v62, 2 }
 0x15a   :  { %v422_v60 = vxor.u32 2147483648, %v421_v31  ;;  %v243_v57 = vadd.s32 %v242_v8, %v238_v21  ;;  %v762_v4 = vsel %vm760_vm13, %v761_v36, %v3121_v18  ;;  %v759_v39 = vsel %vm757_vm15, %v3112_v1, %v758_v59 }
 0x15b   :  { %v763_v43 = vsel %vm756_vm0, %v759_v39, %v762_v4  ;;  %v1379_v20 = vand.u32 3, %v427_v27  ;;  %vm605_vm4 = vcmp.eq.s32.totalorder %v600_v50, 2  ;;  %vm601_vm14 = vcmp.lt.s32.totalorder %v600_v50, 2 }
 0x15c   :  { %v423_v22 = vsel %vm302_vm10, %v422_v60, %v421_v31  ;;  %v244_v24 = vadd.s32 536870912, %v243_v57  ;;  %v3310_v36 = vsel %vm753_vm5, nan, %v763_v43  ;;  %v607_v1 = vsel %vm605_vm4, %v606_v10, %v3246_v47 }
 0x15d   :  { %v426_v55 = vsel %vm3286_vm6, %v2512_v16, %v423_v22  ;;  %vm1384_vm9 = vcmp.eq.s32.totalorder %v1379_v20, 2  ;;  %vm602_vm7 = vcmp.eq.s32.totalorder %v600_v50, 0  ;;  %vm1381_vm5 = vcmp.eq.s32.totalorder %v1379_v20, 0 }
 0x15e   :  { %v428_v6 = vmul.f32 %v426_v55, %v426_v55  ;;  %v3295_v56 = vshrl.u32 %v244_v24, 30  ;;  %v604_v48 = vsel %vm602_vm7, %v3242_v14, %v603_v53  ;;  %vm443_vm10 = vweird.f32 %v2512_v16  ;;  %v2022_v16 = vld [vmem:[%s3395_s3 + $0x18] sm:$0xff] }
 0x15f   :  { %vm1380_vm6 = vcmp.lt.s32.totalorder %v1379_v20, 2  ;;  %vm146_vm13 = vcmp.le.f32.partialorder %v145_v34, 0.7853982  ;;  %v909_v20 = vadd.s32 3, %v2913_v9 }
 0x160   :  { %v429_v19 = vmul.f32 -0.001358992, %v428_v6  ;;  %v436_v28 = vmul.f32 -0.00019511016, %v428_v6  ;;  %v246_v7 = vshll.u32 %v3295_v56, 30 }
 0x162   :  { %v430_v40 = vadd.f32 0.041655596, %v429_v19  ;;  %v437_v33 = vadd.f32 0.008332121, %v436_v28  ;;  %v247_v17 = vsub.s32 %v243_v57, %v246_v7  ;;  %v608_v57 = vsel %vm601_vm14, %v604_v48, %v607_v1 }
 0x163   :  { %v3321_v10 = vsel %vm598_vm8, nan, %v608_v57  ;;  %v444_v19 = vadd.s32 3, %v427_v27  ;;  %vm147_vm8 = vcmp.lt.s32.totalorder %v3453_v45, 0  ;;  %v269_v7 = vsub.s32 4, %v3295_v56 }
 0x164   :  { %v431_v23 = vmul.f32 %v430_v40, %v428_v6  ;;  %v438_v26 = vmul.f32 %v437_v33, %v428_v6  ;;  %vm248_vm3 = vcmp.lt.s32.totalorder %v247_v17, 0  ;;  %v249_v51 = vsub.s32 0, %v247_v17  ;;  %v33_v33 = vld [vmem:[%s3392_s2 + $0x48] sm:$0xff] }
 0x165   :  { %v445_v63 = vand.u32 3, %v444_v19  ;;  %2209 = vmatmul.msk.f32.gmra.mxu0 %vm2039_vm1, %v33_v33  ;;  %vm288_vm1 = vweird.f32 %v3453_v45 }
 0x166   :  { %v432_v54 = vadd.f32 -0.4999988, %v431_v23  ;;  %v439_v41 = vadd.f32 -0.16666654, %v438_v26  ;;  %v250_v32 = vsel %vm248_vm3, %v249_v51, %v247_v17 }
 0x167   :  { %v251_v5 = vclz %v250_v32  ;;  %vm447_vm15 = vcmp.eq.s32.totalorder %v445_v63, 0  ;;  %vm450_vm3 = vcmp.eq.s32.totalorder %v445_v63, 2  ;;  %vm446_vm0 = vcmp.lt.s32.totalorder %v445_v63, 2  ;;  %v3460_v32 = vld [vmem:[#allocation10_spill] sm:$0xff] }
 0x168   :  { %v433_v46 = vmul.f32 %v432_v54, %v428_v6  ;;  %v440_v12 = vmul.f32 %v439_v41, %v428_v6  ;;  %v270_v54 = vsel %vm147_vm8, %v269_v7, %v3295_v56  ;;  %v1064_v43 = vadd.s32 3, %v3460_v32 }
 0x169   :  { %v2170_v61 = vadd.s32 4294967294, %v251_v5  ;;  %v272_v39 = vsel %vm146_vm13, 0, %v270_v54 }
 0x16a   :  { %v434_v37 = vadd.f32 1.0, %v433_v46  ;;  %v441_v31 = vadd.f32 1.0, %v440_v12  ;;  %v289_v5 = vadd.s32 3, %v272_v39  ;;  %v1225_v1 = vand.u32 3, %v272_v39 }
 0x16b   :  { %vm2171_vm2 = vcmp.lt.s32.totalorder %v2170_v61, 0 }
 0x16c   :  { %v442_v60 = vmul.f32 %v441_v31, %v426_v55  ;;  %v451_v21 = vxor.u32 2147483648, %v434_v37  ;;  %v254_v8 = vsel %vm2171_vm2, 0, %v2170_v61  ;;  %v290_v56 = vand.u32 3, %v289_v5 }
 0x16d   :  { %v255_v13 = vsub.s32 32, %v254_v8  ;;  %v259_v22 = vsub.s32 4294967266, %v254_v8  ;;  %v256_v42 = vshll.u32 %v247_v17, %v254_v8  ;;  %vm1230_vm2 = vcmp.eq.s32.totalorder %v1225_v1, 2 }
 0x16e   :  { %v448_v18 = vxor.u32 2147483648, %v442_v60  ;;  %v1386_v59 = vsel %vm1384_vm9, %v451_v21, %v442_v60  ;;  %v452_v26 = vsel %vm450_vm3, %v451_v21, %v442_v60  ;;  %v1065_v21 = vand.u32 3, %v1064_v43 }
 0x16f   :  { %v257_v6 = vshrl.u32 %v3271_v15, %v255_v13  ;;  %v260_v24 = vadd.s32 127, %v259_v22 }
 0x170   :  { %v1383_v11 = vsel %vm1381_vm5, %v434_v37, %v448_v18  ;;  %v449_v23 = vsel %vm447_vm15, %v434_v37, %v448_v18  ;;  %v910_v18 = vand.u32 3, %v909_v20  ;;  %vm1066_vm4 = vcmp.lt.s32.totalorder %v1065_v21, 2 }
 0x171   :  { %v1387_v55 = vsel %vm1380_vm6, %v1383_v11, %v1386_v59  ;;  %v258_v47 = vor.u32 %v257_v6, %v256_v42  ;;  %v261_v53 = vshll.u32 %v260_v24, 23  ;;  %v3335_v27 = vsel %vm446_vm0, %v449_v23, %v452_v26 }
 0x172   :  { %v1388_v14 = vsel %vm443_vm10, nan, %v1387_v55  ;;  %vm1067_vm9 = vcmp.eq.s32.totalorder %v1065_v21, 0  ;;  %vm1070_vm14 = vcmp.eq.s32.totalorder %v1065_v21, 2  ;;  %vm912_vm7 = vcmp.eq.s32.totalorder %v910_v18, 0 }
 0x173   :  { %2093 = vmatpush.msrb.mxu0 %v1388_v14  ;;  %2227 = vmatpush.msra.mxu1 %v1388_v14  ;;  %v262_v28 = vor.u32 4788187, %v261_v53  ;;  %v265_v25 = vcvt.s32.f32 %v258_v47  ;;  %vm295_vm5 = vcmp.eq.s32.totalorder %v290_v56, 2  ;;  %v1069_v57 = vsel %vm1067_vm9, %v2820_v49, %v1068_v58 }
 0x174   :  { %2228 = vmatpush.msra.mxu3 %v1388_v14  ;;  %vm1227_vm6 = vcmp.eq.s32.totalorder %v1225_v1, 0  ;;  %v1072_v55 = vsel %vm1070_vm14, %v1071_v3, %v2828_v35  ;;  %v914_v42 = vsel %vm912_vm7, %v2981_v2, %v913_v44  ;;  %vm291_vm15 = vcmp.lt.s32.totalorder %v290_v56, 2 }
 0x175   :  { %v263_v62 = vand.u32 2147483647, %v262_v28  ;;  %v1073_v47 = vsel %vm1066_vm4, %v1069_v57, %v1072_v55  ;;  %vm915_vm3 = vcmp.eq.s32.totalorder %v910_v18, 2  ;;  %vm911_vm0 = vcmp.lt.s32.totalorder %v910_v18, 2 }
 0x176   :  { %v917_v49 = vsel %vm915_vm3, %v916_v38, %v2989_v0  ;;  %v1074_v3 = vsel %vm1063_vm11, nan, %v1073_v47  ;;  %v454_v29 = vsel %vm443_vm10, nan, %v3335_v27  ;;  %v2020_v0 = vld [vmem:[%s3395_s3 + $0x8] sm:$0xff]  ;;  %v2021_v38 = vld [vmem:[%s3395_s3 + $0x10] sm:$0xff]  ;;  %vm2125_vm11 = vcmask 261120  }
 0x177   :  { %v266_v40 = vmul.f32 %v265_v25, %v263_v62  ;;  %v918_v35 = vsel %vm911_vm0, %v914_v42, %v917_v49 }
 0x178   :  { %v919_v44 = vsel %vm908_vm12, nan, %v918_v35 }
 0x179   :  { %v267_v15 = vxor.u32 2147483648, %v266_v40 }
 0x17b   :  { %v268_v52 = vsel %vm147_vm8, %v267_v15, %v266_v40  ;;  %vm292_vm8 = vcmp.eq.s32.totalorder %v290_v56, 0 }
 0x17c   :  { %v271_v17 = vsel %vm146_vm13, %v3453_v45, %v268_v52  ;;  %vm1226_vm13 = vcmp.lt.s32.totalorder %v1225_v1, 2 }
 0x17d   :  { %v273_v4 = vmul.f32 %v271_v17, %v271_v17 }
 0x17f   :  { %v274_v41 = vmul.f32 -0.001358992, %v273_v4  ;;  %v281_v51 = vmul.f32 -0.00019511016, %v273_v4 }
 0x181   :  { %v275_v50 = vadd.f32 0.041655596, %v274_v41  ;;  %v282_v34 = vadd.f32 0.008332121, %v281_v51 }
 0x183   :  { %v276_v46 = vmul.f32 %v275_v50, %v273_v4  ;;  %v283_v12 = vmul.f32 %v282_v34, %v273_v4 }
 0x185   :  { %v277_v37 = vadd.f32 -0.4999988, %v276_v46  ;;  %v284_v31 = vadd.f32 -0.16666654, %v283_v12 }
 0x187   :  { %v278_v61 = vmul.f32 %v277_v37, %v273_v4  ;;  %v285_v60 = vmul.f32 %v284_v31, %v273_v4  ;;  %v2118_v4 = vld [vmem:[%s3397_s4] sm:$0x3] }
 0x189   :  { %v279_v59 = vadd.f32 1.0, %v278_v61  ;;  %v286_v8 = vadd.f32 1.0, %v285_v60 }
 0x18b   :  { %v287_v48 = vmul.f32 %v286_v8, %v271_v17  ;;  %v296_v13 = vxor.u32 2147483648, %v279_v59 }
 0x18d   :  { %v293_v9 = vxor.u32 2147483648, %v287_v48  ;;  %v1232_v22 = vsel %vm1230_vm2, %v296_v13, %v287_v48  ;;  %v297_v11 = vsel %vm295_vm5, %v296_v13, %v287_v48 }
 0x18f   :  { %v1229_v6 = vsel %vm1227_vm6, %v279_v59, %v293_v9  ;;  %v294_v24 = vsel %vm292_vm8, %v279_v59, %v293_v9 }
 0x190   :  { %v1233_v14 = vsel %vm1226_vm13, %v1229_v6, %v1232_v22  ;;  %v298_v58 = vsel %vm291_vm15, %v294_v24, %v297_v11 }
 0x191   :  { %v1234_v53 = vsel %vm288_vm1, nan, %v1233_v14  ;;  %v299_v2 = vsel %vm288_vm1, nan, %v298_v58 }
 0x192   :  { %2094 = vmatpush.msrb.mxu0 %v1234_v53  ;;  %2229 = vmatpush.msra.mxu1 %v1234_v53 }
 0x193   :  { %2230 = vmatpush.msra.mxu3 %v1234_v53 }
 0x194   :  { %2095 = vmatpush.msrb.mxu0 %v1074_v3  ;;  %2231 = vmatpush.msra.mxu1 %v1074_v3 }
 0x195   :  { %2232 = vmatpush.msra.mxu3 %v1074_v3 }
 0x196   :  { %2096 = vmatpush.msrb.mxu0 %v919_v44  ;;  %2233 = vmatpush.msra.mxu1 %v919_v44 }
 0x197   :  { %2234 = vmatpush.msra.mxu3 %v919_v44 }
 0x198   :  { %2097 = vmatpush.msrb.mxu0 %v3310_v36  ;;  %2235 = vmatpush.msra.mxu1 %v3310_v36 }
 0x199   :  { %2236 = vmatpush.msra.mxu3 %v3310_v36 }
 0x19a   :  { %2098 = vmatpush.msrb.mxu0 %v3321_v10  ;;  %2237 = vmatpush.msra.mxu1 %v3321_v10 }
 0x19b   :  { %2238 = vmatpush.msra.mxu3 %v3321_v10  ;;  %v2119_v10 = vld [vmem:[%s3396_s5] sm:$0x3] }
 0x19c   :  { %2099 = vmatpush.msrb.mxu0 %v454_v29  ;;  %2239 = vmatpush.msra.mxu1 %v454_v29 }
 0x19d   :  { %2240 = vmatpush.msra.mxu3 %v454_v29  ;;  %2122 = vperm.xlu0 %2264, %v2119_v10  }
 0x19e   :  { %2100 = vmatpush.msrb.mxu0 %v299_v2  ;;  %2241 = vmatpush.msra.mxu1 %v299_v2 }
 0x19f   :  { %2242 = vmatpush.msra.mxu3 %v299_v2  ;;  %2101 = vmatmul.f32.vlgmr.msrb.gmra.mxu0 %v2019_v30 }
 0x1a0   :  { %2104 = vmatmul.f32.vlgmr.msra.gmra.mxu1 %v2020_v0  ;;  %2107 = vmatmul.f32.vlgmr.msra.gmra.mxu3 %v2021_v38 }
 0x1a8   :  { %2110 = vmatmul.f32.gmra.mxu3 %v2022_v16 }
 0x1b2   :  { %v2073_v45 = vpop.f32.mrf.mxu0 }
 0x1ba   :  { %v2076_v36 = vpop.f32.mrf.mxu0 }
 0x1c2   :  { %v2079_v19 = vpop.f32.mrf.mxu0 }
 0x1e2   :  { %v2082_v28 = vpop.f32.mrf.mxu0 }
 0x20f   :  { %v2123_v54 = vpop.permute.xlu0 %2122 }
 0x21c   :  { %v2102_v15 = vpop.f32.mrf.mxu0 }
 0x21d   :  { %v2105_v25 = vpop.f32.mrf.mxu1  ;;  %v2103_v23 = vadd.f32 %v2102_v15, %v2073_v45 }
 0x21e   :  { %v2106_v7 = vadd.f32 %v2105_v25, %v2076_v36 }
 0x21f   :  { %v2114_v27 = vmax.f32 %v2103_v23, 0.0 }
 0x220   :  { %v2115_v17 = vmax.f32 %v2106_v7, 0.0 }
 0x223   :  { %v2108_v62 = vpop.f32.mrf.mxu3 }
 0x224   :  { %v2109_v40 = vadd.f32 %v2108_v62, %v2079_v19 }
 0x226   :  { %v2116_v26 = vmax.f32 %v2109_v40, 0.0 }
 0x22b   :  { %v2111_v63 = vpop.f32.mrf.mxu3 }
 0x22c   :  { %v2112_v33 = vadd.f32 %v2111_v63, %v2082_v28 }
 0x22e   :  { %v2117_v52 = vmax.f32 %v2112_v33, 0.0 }
 0x230   :  { %2141 = vmatpush.msra.mxu2 %v2117_v52 }
 0x232   :  { %2142 = vmatpush.msra.mxu2 %v2116_v26 }
 0x234   :  { %2143 = vmatpush.msra.mxu2 %v2115_v17 }
 0x236   :  { %2144 = vmatpush.msra.mxu2 %v2114_v27 }
 0x237   :  { %2210 = vmatmul.msk.f32.vlgmr.msra.gmra.mxu2 %vm2125_vm11, %v2118_v4 }
 0x2ba   :  { %v2146_v41 = vpop.f32.mrf.mxu2 }
 0x2bb   :  { %v2147_v51 = vadd.f32 %v2146_v41, %v2123_v54 }
 0x2bd   :  { %v2150_v39 = vrot.slane %v2147_v51, 1 }
 0x2bf   :  { %v2152_v50 = vmax.f32 %v2147_v51, %v2150_v39 }
 0x2c1   :  { %v2153_v34 = vperm.slane %v2152_v50, 0 }
 0x2c3   :  { %v2154_v46 = vsub.f32 %v2147_v51, %v2153_v34 }
 0x2c5   :  { %v2155_v12 = vmul.f32 1.442695, %v2154_v46 }
 0x2c7   :  { %2265 = vpow2.f32 %v2155_v12 }
 0x2cd   :  { %v2266_v32 = vpop.eup %2265 }
 0x2ce   :  { %v2158_v43 = vrot.slane %v2266_v32, 1 }
 0x2d0   :  { %v2160_v20 = vadd.f32 %v2266_v32, %v2158_v43 }
 0x2d2   :  { %2267 = vrcp.f32 %v2160_v20 }
 0x2d8   :  { %v2268_v5 = vpop.eup %2267 }
 0x2d9   :  { %v2162_v37 = vperm.slane %v2268_v5, 0 }
 0x2db   :  { %v2163_v31 = vmul.f32 %v2266_v32, %v2162_v37 }
 0x2dd   :  { %2164 = vst [vmem:[%s3398_s6] sm:$0x3] %v2163_v31 }

</bundles_post_ra>
